<compile_context>
chip_gen: v6e
topology: v6e:2x2x1
jax: 0.10.0
libtpu: 0.0.40
codegen_flags: <defaults>
</compile_context>

<pallas_src>
import functools

import jax
import jax.numpy as jnp
from jax.experimental import pallas as pl
from jax.experimental.pallas import tpu as pltpu

_LN_EPS = 1e-5
_SQRT_HALF = 0.7071067811865476


# ----------------------------- in-kernel helpers -----------------------------
def _recip(x):
    # EUP approximate reciprocal + one Newton step: relative error ~eps^2
    # (f32-accurate), while the seed runs on the otherwise-idle EUP slot.
    r = pl.reciprocal(x, approx=True)
    return r * (2.0 - x * r)


def _layernorm(x, gamma, beta):
    mu = jnp.mean(x, axis=-1, keepdims=True)
    xc = x - mu
    var = jnp.mean(xc * xc, axis=-1, keepdims=True)
    return xc * jax.lax.rsqrt(var + _LN_EPS) * gamma + beta


def _erf(x):
    # Abramowitz & Stegun 7.1.26 rational approximation (|err| < 1.5e-7).
    # Built only from mul/add/exp/recip/select (all lower on the TPU VPU/EUP).
    a1, a2, a3, a4, a5 = (0.254829592, -0.284496736, 1.421413741,
                          -1.453152027, 1.061405429)
    p = 0.3275911
    ax = jnp.abs(x)
    t = _recip(1.0 + p * ax)
    poly = ((((a5 * t + a4) * t + a3) * t + a2) * t + a1) * t
    y = 1.0 - poly * jnp.exp(-ax * ax)
    return jnp.where(x >= 0.0, y, -y)


def _gelu_exact(x):
    # nn.GELU() default is the exact (erf-based) GELU.
    return 0.5 * x * (1.0 + _erf(x * _SQRT_HALF))


# --------------------------------- kernel ------------------------------------
def _transformer_kernel(x_ref, g1_ref, b1_ref, wqkv_ref, wo_ref, bo_ref,
                        g2_ref, b2_ref, w1_ref, bb1_ref, w2_ref, bb2_ref,
                        o_ref, x_scr, *, heads, dim_head, block_b, seq_len):
    l = pl.program_id(1)                     # layer index (inner, "arbitrary" axis)
    rows = block_b * seq_len
    inner = heads * dim_head
    mm_dtype = wqkv_ref.dtype                # bf16 on v6e/v7x when weights packed bf16

    # Residual stream carried in f32 VMEM scratch across the depth axis.
    @pl.when(l == 0)
    def _():
        x_scr[...] = x_ref[...].astype(jnp.float32)

    x = x_scr[...]                                           # (rows, D) f32

    # ---------------- PreNorm + Attention + residual ----------------
    xn = _layernorm(x, g1_ref[...], b1_ref[...])             # (rows, D)
    # Fused full-width QKV projection; softmax scale is pre-folded into the
    # Q columns of wqkv, so no extra multiply here.
    qkv = jnp.dot(xn.astype(mm_dtype), wqkv_ref[...],
                  preferred_element_type=jnp.float32)        # (rows, 3*inner)
    q = qkv[:, :inner]
    k = qkv[:, inner:2 * inner]
    v = qkv[:, 2 * inner:]

    # Per-head scores / softmax (projections already fused above; the score
    # matmuls are inherently per-head).  Head outputs are packed along lanes
    # and projected with ONE wide-K matmul below.
    head_outs = []
    for h in range(heads):                                   # static; small body
        sl = slice(h * dim_head, (h + 1) * dim_head)
        qh = q[:, sl].reshape(block_b, seq_len, dim_head)
        kh = k[:, sl].reshape(block_b, seq_len, dim_head)
        vh = v[:, sl].reshape(block_b, seq_len, dim_head)
        s = jnp.einsum('bnd,bmd->bnm', qh.astype(mm_dtype), kh.astype(mm_dtype),
                       preferred_element_type=jnp.float32)   # (block_b, N, N)
        m = jnp.max(s, axis=-1, keepdims=True)
        e = jnp.exp(s - m)
        p = e * _recip(jnp.sum(e, axis=-1, keepdims=True))   # softmax (Newton-refined)
        oh = jnp.einsum('bnm,bmd->bnd', p.astype(mm_dtype), vh.astype(mm_dtype),
                        preferred_element_type=jnp.float32)  # (block_b, N, dh)
        head_outs.append(oh.reshape(rows, dim_head))
    att = jnp.concatenate(head_outs, axis=-1)                # (rows, inner), h-major
    x = x + jnp.dot(att.astype(mm_dtype), wo_ref[...],
                    preferred_element_type=jnp.float32) + bo_ref[...]

    # ---------------- PreNorm + FeedForward + residual ----------------
    xn2 = _layernorm(x, g2_ref[...], b2_ref[...])
    hdn = jnp.dot(xn2.astype(mm_dtype), w1_ref[...],
                  preferred_element_type=jnp.float32) + bb1_ref[...]
    hdn = _gelu_exact(hdn)
    x = x + jnp.dot(hdn.astype(mm_dtype), w2_ref[...],
                    preferred_element_type=jnp.float32) + bb2_ref[...]

    x_scr[...] = x

    @pl.when(l == pl.num_programs(1) - 1)
    def _():
        o_ref[...] = x.astype(o_ref.dtype)


# ------------------------------- host wrapper ---------------------------------
def pack_params(layers, *, heads, dim_head, weight_dtype=jnp.float32):
    """Stack per-layer torch-convention weights into kernel-friendly layouts.

    Set weight_dtype=jnp.bfloat16 on v6e/v7x for bf16-in/f32-acc matmuls
    (halves weight DMA/VMEM and uses the MXU's native operand type).
    """
    depth = len(layers)
    inner = heads * dim_head
    scale = dim_head ** (-0.5)

    def stack(key):
        return jnp.stack([L[key] for L in layers])

    w_qkv = stack('w_qkv')                                   # (depth, 3*inner, D) torch layout
    D = w_qkv.shape[-1]
    w_qkv = w_qkv.at[:, :inner, :].multiply(scale)           # fold softmax scale into Q rows
    wqkv = w_qkv.transpose(0, 2, 1)                          # (depth, D, 3*inner)

    mlp = layers[0]['w1'].shape[0]
    return dict(
        ln1_g=stack('ln1_g').reshape(depth, 1, D),
        ln1_b=stack('ln1_b').reshape(depth, 1, D),
        wqkv=wqkv.astype(weight_dtype),
        wo=stack('w_out').transpose(0, 2, 1).astype(weight_dtype),   # (depth, inner, D)
        b_out=stack('b_out').reshape(depth, 1, D),
        ln2_g=stack('ln2_g').reshape(depth, 1, D),
        ln2_b=stack('ln2_b').reshape(depth, 1, D),
        w1=stack('w1').transpose(0, 2, 1).astype(weight_dtype),      # (depth, D, mlp)
        b1=stack('b1').reshape(depth, 1, mlp),
        w2=stack('w2').transpose(0, 2, 1).astype(weight_dtype),      # (depth, mlp, D)
        b2=stack('b2').reshape(depth, 1, D),
    )


def transformer_pallas(x, params, *, heads, dim_head, block_b=None):
    B, N, D = x.shape
    depth = params['wqkv'].shape[0]
    assert params['wqkv'].shape[-1] == 3 * heads * dim_head

    if block_b is None:
        # Target ~512-row tiles (measured mem-bound sweet spot), divisor of B.
        block_b = max(1, min(B, 512 // max(N, 1)))
        while B % block_b:
            block_b -= 1
    assert B % block_b == 0
    rows = block_b * N
    assert rows % 8 == 0, "block rows must be a multiple of 8 sublanes"

    x_flat = x.reshape(B * N, D)                             # free: contiguous in HBM

    kernel = functools.partial(_transformer_kernel, heads=heads, dim_head=dim_head,
                               block_b=block_b, seq_len=N)

    # Per-layer weight blocks: only the current layer's weights live in VMEM;
    # the pipeline double-buffers them so layer l+1 streams behind layer l.
    def layer_spec(a):
        nd = a.ndim
        return pl.BlockSpec((None,) + a.shape[1:],
                            lambda b, l: (l,) + (0,) * (nd - 1))

    weight_keys = ('ln1_g', 'ln1_b', 'wqkv', 'wo', 'b_out',
                   'ln2_g', 'ln2_b', 'w1', 'b1', 'w2', 'b2')
    weights = [params[k] for k in weight_keys]

    out = pl.pallas_call(
        kernel,
        out_shape=jax.ShapeDtypeStruct((B * N, D), x.dtype),
        grid_spec=pltpu.PrefetchScalarGridSpec(
            num_scalar_prefetch=0,
            grid=(B // block_b, depth),                      # depth = inner, carried axis
            in_specs=[pl.BlockSpec((rows, D), lambda b, l: (b, 0))]
                     + [layer_spec(w) for w in weights],
            out_specs=pl.BlockSpec((rows, D), lambda b, l: (b, 0)),
            scratch_shapes=[pltpu.VMEM((rows, D), jnp.float32)],   # carried residual
        ),
        compiler_params=pltpu.CompilerParams(
            dimension_semantics=("parallel", "arbitrary")),
    )(x_flat, *weights)
    return out.reshape(B, N, D)


# ------------------------------ pure-JAX reference ----------------------------
def transformer_reference(x, layers, *, heads, dim_head):
    """Faithful reproduction of the PyTorch Transformer.forward (eval mode)."""
    B, N, D = x.shape
    inner = heads * dim_head
    scale = dim_head ** (-0.5)

    def ln(t, g, b):
        mu = t.mean(-1, keepdims=True)
        var = ((t - mu) ** 2).mean(-1, keepdims=True)
        return (t - mu) / jnp.sqrt(var + _LN_EPS) * g + b

    for L in layers:
        xn = ln(x, L['ln1_g'], L['ln1_b'])
        qkv = xn @ L['w_qkv'].T
        q, k, v = jnp.split(qkv, 3, axis=-1)

        def to_heads(t):
            return t.reshape(B, N, heads, dim_head).transpose(0, 2, 1, 3)

        q, k, v = map(to_heads, (q, k, v))
        dots = jnp.einsum('bhnd,bhmd->bhnm', q, k) * scale
        attn = jax.nn.softmax(dots, axis=-1)
        out = jnp.einsum('bhnm,bhmd->bhnd', attn, v)
        out = out.transpose(0, 2, 1, 3).reshape(B, N, inner)
        x = out @ L['w_out'].T + L['b_out'] + x

        xn2 = ln(x, L['ln2_g'], L['ln2_b'])
        h = jax.nn.gelu(xn2 @ L['w1'].T + L['b1'], approximate=False)
        x = h @ L['w2'].T + L['b2'] + x
    return x


# ----------------------------------- demo -------------------------------------
if __name__ == "__main__":
    DIM, DEPTH, HEADS, DIM_HEAD, MLP_DIM = 32, 2, 4, 16, 64
    B, N = 8, 8
    INNER = HEADS * DIM_HEAD

    key = jax.random.PRNGKey(0)
    key, kx = jax.random.split(key)
    layer_keys = jax.random.split(key, DEPTH)

    def make_layer(k):
        ks = jax.random.split(k, 10)
        return dict(
            ln1_g=1.0 + 0.1 * jax.random.normal(ks[0], (DIM,), jnp.float32),
            ln1_b=0.05 * jax.random.normal(ks[1], (DIM,), jnp.float32),
            w_qkv=jax.random.normal(ks[2], (3 * INNER, DIM), jnp.float32) * DIM ** -0.5,
            w_out=jax.random.normal(ks[3], (DIM, INNER), jnp.float32) * INNER ** -0.5,
            b_out=0.01 * jax.random.normal(ks[4], (DIM,), jnp.float32),
            ln2_g=1.0 + 0.1 * jax.random.normal(ks[5], (DIM,), jnp.float32),
            ln2_b=0.05 * jax.random.normal(ks[6], (DIM,), jnp.float32),
            w1=jax.random.normal(ks[7], (MLP_DIM, DIM), jnp.float32) * DIM ** -0.5,
            b1=0.01 * jax.random.normal(ks[8], (MLP_DIM,), jnp.float32),
            w2=jax.random.normal(ks[9], (DIM, MLP_DIM), jnp.float32) * MLP_DIM ** -0.5,
            b2=jnp.zeros((DIM,), jnp.float32),
        )

    layers = [make_layer(k) for k in layer_keys]
    x = jax.random.normal(kx, (B, N, DIM), jnp.float32)

    # f32 weights for the tight numerical check; on v6e/v7x pass
    # weight_dtype=jnp.bfloat16 for MXU-native operands.
    params = pack_params(layers, heads=HEADS, dim_head=DIM_HEAD)
    # grid = (2 row blocks, 2 layers): row axis "parallel" (megacore), depth
    # axis "arbitrary" (carried residual + streamed per-layer weights).
    y = transformer_pallas(x, params, heads=HEADS, dim_head=DIM_HEAD, block_b=4)
    y = jax.block_until_ready(y)

    y_ref = transformer_reference(x, layers, heads=HEADS, dim_head=DIM_HEAD)
    err = float(jnp.max(jnp.abs(y - y_ref)))
    assert jnp.allclose(y, y_ref, atol=2e-3, rtol=2e-3), \
        f"mismatch vs reference (max abs err {err})"

    print("KERNEL_OK")
</pallas_src>

<mosaic_0001>
module attributes {stable_mosaic.version = 11 : i64} {
  func.func @_transformer_kernel(%arg0: i32, %arg1: i32, %arg2: memref<32x32xf32, #tpu.memory_space<vmem>>, %arg3: memref<1x1x32xf32, #tpu.memory_space<vmem>>, %arg4: memref<1x1x32xf32, #tpu.memory_space<vmem>>, %arg5: memref<1x32x192xf32, #tpu.memory_space<vmem>>, %arg6: memref<1x64x32xf32, #tpu.memory_space<vmem>>, %arg7: memref<1x1x32xf32, #tpu.memory_space<vmem>>, %arg8: memref<1x1x32xf32, #tpu.memory_space<vmem>>, %arg9: memref<1x1x32xf32, #tpu.memory_space<vmem>>, %arg10: memref<1x32x64xf32, #tpu.memory_space<vmem>>, %arg11: memref<1x1x64xf32, #tpu.memory_space<vmem>>, %arg12: memref<1x64x32xf32, #tpu.memory_space<vmem>>, %arg13: memref<1x1x32xf32, #tpu.memory_space<vmem>>, %arg14: memref<32x32xf32, #tpu.memory_space<vmem>>, %arg15: memref<32x32xf32, #tpu.memory_space<vmem>>) attributes {dimension_semantics = [#tpu.dimension_semantics<parallel>, #tpu.dimension_semantics<arbitrary>], iteration_bounds = array<i64: 2, 2>, scalar_prefetch = 0 : i64, scratch_operands = 1 : i64, tpu.core_type = #tpu.core_type<tc>, window_params = [{transform_indices = @transform_0, window_bounds = array<i64: 32, 32>}, {transform_indices = @transform_1, window_bounds = array<i64: 1, 1, 32>}, {transform_indices = @transform_2, window_bounds = array<i64: 1, 1, 32>}, {transform_indices = @transform_3, window_bounds = array<i64: 1, 32, 192>}, {transform_indices = @transform_4, window_bounds = array<i64: 1, 64, 32>}, {transform_indices = @transform_5, window_bounds = array<i64: 1, 1, 32>}, {transform_indices = @transform_6, window_bounds = array<i64: 1, 1, 32>}, {transform_indices = @transform_7, window_bounds = array<i64: 1, 1, 32>}, {transform_indices = @transform_8, window_bounds = array<i64: 1, 32, 64>}, {transform_indices = @transform_9, window_bounds = array<i64: 1, 1, 64>}, {transform_indices = @transform_10, window_bounds = array<i64: 1, 64, 32>}, {transform_indices = @transform_11, window_bounds = array<i64: 1, 1, 32>}, {transform_indices = @transform_12, window_bounds = array<i64: 32, 32>}]} {
    %c0_i32 = arith.constant 0 : i32
    %0 = arith.cmpi eq, %arg1, %c0_i32 : i32
    %1 = arith.extui %0 : i1 to i32
    %c0_i32_0 = arith.constant 0 : i32
    %2 = arith.cmpi ne, %1, %c0_i32_0 : i32
    scf.if %2 {
      %c0_86 = arith.constant 0 : index
      %c0_87 = arith.constant 0 : index
      %221 = vector.load %arg2[%c0_86, %c0_87] : memref<32x32xf32, #tpu.memory_space<vmem>>, vector<32x32xf32>
      %c0_88 = arith.constant 0 : index
      %c0_89 = arith.constant 0 : index
      %222 = vector.load %arg15[%c0_88, %c0_89] : memref<32x32xf32, #tpu.memory_space<vmem>>, vector<32x32xf32>
      tpu.vector_store %arg15[%c0_88, %c0_89], %221 {strides = array<i32>} : memref<32x32xf32, #tpu.memory_space<vmem>>, vector<32x32xf32>,
    } else {
    }
    %c0 = arith.constant 0 : index
    %c0_1 = arith.constant 0 : index
    %3 = vector.load %arg15[%c0, %c0_1] : memref<32x32xf32, #tpu.memory_space<vmem>>, vector<32x32xf32>
    %c0_2 = arith.constant 0 : index
    %c0_3 = arith.constant 0 : index
    %c0_4 = arith.constant 0 : index
    %4 = vector.load %arg3[%c0_2, %c0_3, %c0_4] : memref<1x1x32xf32, #tpu.memory_space<vmem>>, vector<1x1x32xf32>
    %5 = vector.shape_cast %4 : vector<1x1x32xf32> to vector<1x32xf32>
    %c0_5 = arith.constant 0 : index
    %c0_6 = arith.constant 0 : index
    %c0_7 = arith.constant 0 : index
    %6 = vector.load %arg4[%c0_5, %c0_6, %c0_7] : memref<1x1x32xf32, #tpu.memory_space<vmem>>, vector<1x1x32xf32>
    %7 = vector.shape_cast %6 : vector<1x1x32xf32> to vector<1x32xf32>
    %cst = arith.constant dense<0.000000e+00> : vector<32xf32>
    %8 = vector.multi_reduction <add>, %3, %cst [1] : vector<32x32xf32> to vector<32xf32>
    %9 = vector.shape_cast %8 : vector<32xf32> to vector<32x1xf32>
    %cst_8 = arith.constant 3.200000e+01 : f32
    %10 = vector.broadcast %cst_8 : f32 to vector<32x1xf32>
    %11 = arith.divf %9, %10 : vector<32x1xf32>
    %12 = vector.broadcast %11 : vector<32x1xf32> to vector<32x32xf32>
    %13 = arith.subf %3, %12 : vector<32x32xf32>
    %14 = arith.mulf %13, %13 : vector<32x32xf32>
    %cst_9 = arith.constant dense<0.000000e+00> : vector<32xf32>
    %15 = vector.multi_reduction <add>, %14, %cst_9 [1] : vector<32x32xf32> to vector<32xf32>
    %16 = vector.shape_cast %15 : vector<32xf32> to vector<32x1xf32>
    %cst_10 = arith.constant 3.200000e+01 : f32
    %17 = vector.broadcast %cst_10 : f32 to vector<32x1xf32>
    %18 = arith.divf %16, %17 : vector<32x1xf32>
    %cst_11 = arith.constant 9.99999974E-6 : f32
    %19 = vector.broadcast %cst_11 : f32 to vector<32x1xf32>
    %20 = arith.addf %18, %19 : vector<32x1xf32>
    %21 = math.rsqrt %20 : vector<32x1xf32>
    %22 = vector.broadcast %21 : vector<32x1xf32> to vector<32x32xf32>
    %23 = arith.mulf %13, %22 : vector<32x32xf32>
    %24 = vector.broadcast %5 : vector<1x32xf32> to vector<32x32xf32>
    %25 = arith.mulf %23, %24 : vector<32x32xf32>
    %26 = vector.broadcast %7 : vector<1x32xf32> to vector<32x32xf32>
    %27 = arith.addf %25, %26 : vector<32x32xf32>
    %c0_12 = arith.constant 0 : index
    %c0_13 = arith.constant 0 : index
    %c0_14 = arith.constant 0 : index
    %28 = vector.load %arg5[%c0_12, %c0_13, %c0_14] : memref<1x32x192xf32, #tpu.memory_space<vmem>>, vector<1x32x192xf32>
    %29 = vector.shape_cast %28 : vector<1x32x192xf32> to vector<32x192xf32>
    %cst_15 = arith.constant dense<0.000000e+00> : vector<32x192xf32>
    %30 = tpu.matmul %27, %29, %cst_15 {dimension_numbers = #tpu.dot_dimension_numbers<[1], [0], [0], [1], [0, 0, 1, 1], [], []>} : vector<32x32xf32>, vector<32x192xf32>, vector<32x192xf32> -> vector<32x192xf32>
    %31 = vector.extract_strided_slice %30 {offsets = [0, 0], sizes = [32, 64], strides = [1, 1]} : vector<32x192xf32> to vector<32x64xf32>
    %32 = vector.extract_strided_slice %30 {offsets = [0, 64], sizes = [32, 64], strides = [1, 1]} : vector<32x192xf32> to vector<32x64xf32>
    %33 = vector.extract_strided_slice %30 {offsets = [0, 128], sizes = [32, 64], strides = [1, 1]} : vector<32x192xf32> to vector<32x64xf32>
    %34 = vector.extract_strided_slice %31 {offsets = [0, 0], sizes = [32, 16], strides = [1, 1]} : vector<32x64xf32> to vector<32x16xf32>
    %35 = vector.shape_cast %34 : vector<32x16xf32> to vector<4x8x16xf32>
    %36 = vector.extract_strided_slice %32 {offsets = [0, 0], sizes = [32, 16], strides = [1, 1]} : vector<32x64xf32> to vector<32x16xf32>
    %37 = vector.shape_cast %36 : vector<32x16xf32> to vector<4x8x16xf32>
    %38 = vector.extract_strided_slice %33 {offsets = [0, 0], sizes = [32, 16], strides = [1, 1]} : vector<32x64xf32> to vector<32x16xf32>
    %39 = vector.shape_cast %38 : vector<32x16xf32> to vector<4x8x16xf32>
    "tpu.trace_start"() <{level = 10 : i32, message = "bnd,bmd->bnm"}> : () -> ()
    %cst_16 = arith.constant dense<0.000000e+00> : vector<4x8x8xf32>
    %40 = tpu.matmul %35, %37, %cst_16 {dimension_numbers = #tpu.dot_dimension_numbers<[2], [2], [1], [1], [0, 0, 0, 1, 1, 1], [0], [0]>} : vector<4x8x16xf32>, vector<4x8x16xf32>, vector<4x8x8xf32> -> vector<4x8x8xf32>
    "tpu.trace_stop"() : () -> ()
    %cst_17 = arith.constant dense<0xFF800000> : vector<4x8xf32>
    %41 = vector.multi_reduction <maximumf>, %40, %cst_17 [2] : vector<4x8x8xf32> to vector<4x8xf32>
    %42 = vector.shape_cast %41 : vector<4x8xf32> to vector<4x8x1xf32>
    %43 = vector.broadcast %42 : vector<4x8x1xf32> to vector<4x8x8xf32>
    %44 = arith.subf %40, %43 : vector<4x8x8xf32>
    %45 = math.exp %44 : vector<4x8x8xf32>
    %cst_18 = arith.constant dense<0.000000e+00> : vector<4x8xf32>
    %46 = vector.multi_reduction <add>, %45, %cst_18 [2] : vector<4x8x8xf32> to vector<4x8xf32>
    %47 = vector.shape_cast %46 : vector<4x8xf32> to vector<4x8x1xf32>
    %48 = tpu.reciprocal %47 {approx = true} : vector<4x8x1xf32> -> vector<4x8x1xf32>
    %49 = arith.mulf %47, %48 : vector<4x8x1xf32>
    %cst_19 = arith.constant 2.000000e+00 : f32
    %50 = vector.broadcast %cst_19 : f32 to vector<4x8x1xf32>
    %51 = arith.subf %50, %49 : vector<4x8x1xf32>
    %52 = arith.mulf %48, %51 : vector<4x8x1xf32>
    %53 = vector.broadcast %52 : vector<4x8x1xf32> to vector<4x8x8xf32>
    %54 = arith.mulf %45, %53 : vector<4x8x8xf32>
    "tpu.trace_start"() <{level = 10 : i32, message = "bnm,bmd->bnd"}> : () -> ()
    %cst_20 = arith.constant dense<0.000000e+00> : vector<4x8x16xf32>
    %55 = tpu.matmul %54, %39, %cst_20 {dimension_numbers = #tpu.dot_dimension_numbers<[2], [1], [1], [2], [0, 0, 0, 1, 1, 2], [0], [0]>} : vector<4x8x8xf32>, vector<4x8x16xf32>, vector<4x8x16xf32> -> vector<4x8x16xf32>
    "tpu.trace_stop"() : () -> ()
    %56 = vector.shape_cast %55 : vector<4x8x16xf32> to vector<32x16xf32>
    %57 = vector.extract_strided_slice %31 {offsets = [0, 16], sizes = [32, 16], strides = [1, 1]} : vector<32x64xf32> to vector<32x16xf32>
    %58 = vector.shape_cast %57 : vector<32x16xf32> to vector<4x8x16xf32>
    %59 = vector.extract_strided_slice %32 {offsets = [0, 16], sizes = [32, 16], strides = [1, 1]} : vector<32x64xf32> to vector<32x16xf32>
    %60 = vector.shape_cast %59 : vector<32x16xf32> to vector<4x8x16xf32>
    %61 = vector.extract_strided_slice %33 {offsets = [0, 16], sizes = [32, 16], strides = [1, 1]} : vector<32x64xf32> to vector<32x16xf32>
    %62 = vector.shape_cast %61 : vector<32x16xf32> to vector<4x8x16xf32>
    "tpu.trace_start"() <{level = 10 : i32, message = "bnd,bmd->bnm"}> : () -> ()
    %cst_21 = arith.constant dense<0.000000e+00> : vector<4x8x8xf32>
    %63 = tpu.matmul %58, %60, %cst_21 {dimension_numbers = #tpu.dot_dimension_numbers<[2], [2], [1], [1], [0, 0, 0, 1, 1, 1], [0], [0]>} : vector<4x8x16xf32>, vector<4x8x16xf32>, vector<4x8x8xf32> -> vector<4x8x8xf32>
    "tpu.trace_stop"() : () -> ()
    %cst_22 = arith.constant dense<0xFF800000> : vector<4x8xf32>
    %64 = vector.multi_reduction <maximumf>, %63, %cst_22 [2] : vector<4x8x8xf32> to vector<4x8xf32>
    %65 = vector.shape_cast %64 : vector<4x8xf32> to vector<4x8x1xf32>
    %66 = vector.broadcast %65 : vector<4x8x1xf32> to vector<4x8x8xf32>
    %67 = arith.subf %63, %66 : vector<4x8x8xf32>
    %68 = math.exp %67 : vector<4x8x8xf32>
    %cst_23 = arith.constant dense<0.000000e+00> : vector<4x8xf32>
    %69 = vector.multi_reduction <add>, %68, %cst_23 [2] : vector<4x8x8xf32> to vector<4x8xf32>
    %70 = vector.shape_cast %69 : vector<4x8xf32> to vector<4x8x1xf32>
    %71 = tpu.reciprocal %70 {approx = true} : vector<4x8x1xf32> -> vector<4x8x1xf32>
    %72 = arith.mulf %70, %71 : vector<4x8x1xf32>
    %cst_24 = arith.constant 2.000000e+00 : f32
    %73 = vector.broadcast %cst_24 : f32 to vector<4x8x1xf32>
    %74 = arith.subf %73, %72 : vector<4x8x1xf32>
    %75 = arith.mulf %71, %74 : vector<4x8x1xf32>
    %76 = vector.broadcast %75 : vector<4x8x1xf32> to vector<4x8x8xf32>
    %77 = arith.mulf %68, %76 : vector<4x8x8xf32>
    "tpu.trace_start"() <{level = 10 : i32, message = "bnm,bmd->bnd"}> : () -> ()
    %cst_25 = arith.constant dense<0.000000e+00> : vector<4x8x16xf32>
    %78 = tpu.matmul %77, %62, %cst_25 {dimension_numbers = #tpu.dot_dimension_numbers<[2], [1], [1], [2], [0, 0, 0, 1, 1, 2], [0], [0]>} : vector<4x8x8xf32>, vector<4x8x16xf32>, vector<4x8x16xf32> -> vector<4x8x16xf32>
    "tpu.trace_stop"() : () -> ()
    %79 = vector.shape_cast %78 : vector<4x8x16xf32> to vector<32x16xf32>
    %80 = vector.extract_strided_slice %31 {offsets = [0, 32], sizes = [32, 16], strides = [1, 1]} : vector<32x64xf32> to vector<32x16xf32>
    %81 = vector.shape_cast %80 : vector<32x16xf32> to vector<4x8x16xf32>
    %82 = vector.extract_strided_slice %32 {offsets = [0, 32], sizes = [32, 16], strides = [1, 1]} : vector<32x64xf32> to vector<32x16xf32>
    %83 = vector.shape_cast %82 : vector<32x16xf32> to vector<4x8x16xf32>
    %84 = vector.extract_strided_slice %33 {offsets = [0, 32], sizes = [32, 16], strides = [1, 1]} : vector<32x64xf32> to vector<32x16xf32>
    %85 = vector.shape_cast %84 : vector<32x16xf32> to vector<4x8x16xf32>
    "tpu.trace_start"() <{level = 10 : i32, message = "bnd,bmd->bnm"}> : () -> ()
    %cst_26 = arith.constant dense<0.000000e+00> : vector<4x8x8xf32>
    %86 = tpu.matmul %81, %83, %cst_26 {dimension_numbers = #tpu.dot_dimension_numbers<[2], [2], [1], [1], [0, 0, 0, 1, 1, 1], [0], [0]>} : vector<4x8x16xf32>, vector<4x8x16xf32>, vector<4x8x8xf32> -> vector<4x8x8xf32>
    "tpu.trace_stop"() : () -> ()
    %cst_27 = arith.constant dense<0xFF800000> : vector<4x8xf32>
    %87 = vector.multi_reduction <maximumf>, %86, %cst_27 [2] : vector<4x8x8xf32> to vector<4x8xf32>
    %88 = vector.shape_cast %87 : vector<4x8xf32> to vector<4x8x1xf32>
    %89 = vector.broadcast %88 : vector<4x8x1xf32> to vector<4x8x8xf32>
    %90 = arith.subf %86, %89 : vector<4x8x8xf32>
    %91 = math.exp %90 : vector<4x8x8xf32>
    %cst_28 = arith.constant dense<0.000000e+00> : vector<4x8xf32>
    %92 = vector.multi_reduction <add>, %91, %cst_28 [2] : vector<4x8x8xf32> to vector<4x8xf32>
    %93 = vector.shape_cast %92 : vector<4x8xf32> to vector<4x8x1xf32>
    %94 = tpu.reciprocal %93 {approx = true} : vector<4x8x1xf32> -> vector<4x8x1xf32>
    %95 = arith.mulf %93, %94 : vector<4x8x1xf32>
    %cst_29 = arith.constant 2.000000e+00 : f32
    %96 = vector.broadcast %cst_29 : f32 to vector<4x8x1xf32>
    %97 = arith.subf %96, %95 : vector<4x8x1xf32>
    %98 = arith.mulf %94, %97 : vector<4x8x1xf32>
    %99 = vector.broadcast %98 : vector<4x8x1xf32> to vector<4x8x8xf32>
    %100 = arith.mulf %91, %99 : vector<4x8x8xf32>
    "tpu.trace_start"() <{level = 10 : i32, message = "bnm,bmd->bnd"}> : () -> ()
    %cst_30 = arith.constant dense<0.000000e+00> : vector<4x8x16xf32>
    %101 = tpu.matmul %100, %85, %cst_30 {dimension_numbers = #tpu.dot_dimension_numbers<[2], [1], [1], [2], [0, 0, 0, 1, 1, 2], [0], [0]>} : vector<4x8x8xf32>, vector<4x8x16xf32>, vector<4x8x16xf32> -> vector<4x8x16xf32>
    "tpu.trace_stop"() : () -> ()
    %102 = vector.shape_cast %101 : vector<4x8x16xf32> to vector<32x16xf32>
    %103 = vector.extract_strided_slice %31 {offsets = [0, 48], sizes = [32, 16], strides = [1, 1]} : vector<32x64xf32> to vector<32x16xf32>
    %104 = vector.shape_cast %103 : vector<32x16xf32> to vector<4x8x16xf32>
    %105 = vector.extract_strided_slice %32 {offsets = [0, 48], sizes = [32, 16], strides = [1, 1]} : vector<32x64xf32> to vector<32x16xf32>
    %106 = vector.shape_cast %105 : vector<32x16xf32> to vector<4x8x16xf32>
    %107 = vector.extract_strided_slice %33 {offsets = [0, 48], sizes = [32, 16], strides = [1, 1]} : vector<32x64xf32> to vector<32x16xf32>
    %108 = vector.shape_cast %107 : vector<32x16xf32> to vector<4x8x16xf32>
    "tpu.trace_start"() <{level = 10 : i32, message = "bnd,bmd->bnm"}> : () -> ()
    %cst_31 = arith.constant dense<0.000000e+00> : vector<4x8x8xf32>
    %109 = tpu.matmul %104, %106, %cst_31 {dimension_numbers = #tpu.dot_dimension_numbers<[2], [2], [1], [1], [0, 0, 0, 1, 1, 1], [0], [0]>} : vector<4x8x16xf32>, vector<4x8x16xf32>, vector<4x8x8xf32> -> vector<4x8x8xf32>
    "tpu.trace_stop"() : () -> ()
    %cst_32 = arith.constant dense<0xFF800000> : vector<4x8xf32>
    %110 = vector.multi_reduction <maximumf>, %109, %cst_32 [2] : vector<4x8x8xf32> to vector<4x8xf32>
    %111 = vector.shape_cast %110 : vector<4x8xf32> to vector<4x8x1xf32>
    %112 = vector.broadcast %111 : vector<4x8x1xf32> to vector<4x8x8xf32>
    %113 = arith.subf %109, %112 : vector<4x8x8xf32>
    %114 = math.exp %113 : vector<4x8x8xf32>
    %cst_33 = arith.constant dense<0.000000e+00> : vector<4x8xf32>
    %115 = vector.multi_reduction <add>, %114, %cst_33 [2] : vector<4x8x8xf32> to vector<4x8xf32>
    %116 = vector.shape_cast %115 : vector<4x8xf32> to vector<4x8x1xf32>
    %117 = tpu.reciprocal %116 {approx = true} : vector<4x8x1xf32> -> vector<4x8x1xf32>
    %118 = arith.mulf %116, %117 : vector<4x8x1xf32>
    %cst_34 = arith.constant 2.000000e+00 : f32
    %119 = vector.broadcast %cst_34 : f32 to vector<4x8x1xf32>
    %120 = arith.subf %119, %118 : vector<4x8x1xf32>
    %121 = arith.mulf %117, %120 : vector<4x8x1xf32>
    %122 = vector.broadcast %121 : vector<4x8x1xf32> to vector<4x8x8xf32>
    %123 = arith.mulf %114, %122 : vector<4x8x8xf32>
    "tpu.trace_start"() <{level = 10 : i32, message = "bnm,bmd->bnd"}> : () -> ()
    %cst_35 = arith.constant dense<0.000000e+00> : vector<4x8x16xf32>
    %124 = tpu.matmul %123, %108, %cst_35 {dimension_numbers = #tpu.dot_dimension_numbers<[2], [1], [1], [2], [0, 0, 0, 1, 1, 2], [0], [0]>} : vector<4x8x8xf32>, vector<4x8x16xf32>, vector<4x8x16xf32> -> vector<4x8x16xf32>
    "tpu.trace_stop"() : () -> ()
    %125 = vector.shape_cast %124 : vector<4x8x16xf32> to vector<32x16xf32>
    %126 = tpu.concatenate %56, %79, %102, %125 in 1 : vector<32x16xf32>, vector<32x16xf32>, vector<32x16xf32>, vector<32x16xf32> -> vector<32x64xf32>
    %c0_36 = arith.constant 0 : index
    %c0_37 = arith.constant 0 : index
    %c0_38 = arith.constant 0 : index
    %127 = vector.load %arg6[%c0_36, %c0_37, %c0_38] : memref<1x64x32xf32, #tpu.memory_space<vmem>>, vector<1x64x32xf32>
    %128 = vector.shape_cast %127 : vector<1x64x32xf32> to vector<64x32xf32>
    %cst_39 = arith.constant dense<0.000000e+00> : vector<32x32xf32>
    %129 = tpu.matmul %126, %128, %cst_39 {dimension_numbers = #tpu.dot_dimension_numbers<[1], [0], [0], [1], [0, 0, 1, 1], [], []>} : vector<32x64xf32>, vector<64x32xf32>, vector<32x32xf32> -> vector<32x32xf32>
    %130 = arith.addf %3, %129 : vector<32x32xf32>
    %c0_40 = arith.constant 0 : index
    %c0_41 = arith.constant 0 : index
    %c0_42 = arith.constant 0 : index
    %131 = vector.load %arg7[%c0_40, %c0_41, %c0_42] : memref<1x1x32xf32, #tpu.memory_space<vmem>>, vector<1x1x32xf32>
    %132 = vector.shape_cast %131 : vector<1x1x32xf32> to vector<1x32xf32>
    %133 = vector.broadcast %132 : vector<1x32xf32> to vector<32x32xf32>
    %134 = arith.addf %130, %133 : vector<32x32xf32>
    %c0_43 = arith.constant 0 : index
    %c0_44 = arith.constant 0 : index
    %c0_45 = arith.constant 0 : index
    %135 = vector.load %arg8[%c0_43, %c0_44, %c0_45] : memref<1x1x32xf32, #tpu.memory_space<vmem>>, vector<1x1x32xf32>
    %136 = vector.shape_cast %135 : vector<1x1x32xf32> to vector<1x32xf32>
    %c0_46 = arith.constant 0 : index
    %c0_47 = arith.constant 0 : index
    %c0_48 = arith.constant 0 : index
    %137 = vector.load %arg9[%c0_46, %c0_47, %c0_48] : memref<1x1x32xf32, #tpu.memory_space<vmem>>, vector<1x1x32xf32>
    %138 = vector.shape_cast %137 : vector<1x1x32xf32> to vector<1x32xf32>
    %cst_49 = arith.constant dense<0.000000e+00> : vector<32xf32>
    %139 = vector.multi_reduction <add>, %134, %cst_49 [1] : vector<32x32xf32> to vector<32xf32>
    %140 = vector.shape_cast %139 : vector<32xf32> to vector<32x1xf32>
    %cst_50 = arith.constant 3.200000e+01 : f32
    %141 = vector.broadcast %cst_50 : f32 to vector<32x1xf32>
    %142 = arith.divf %140, %141 : vector<32x1xf32>
    %143 = vector.broadcast %142 : vector<32x1xf32> to vector<32x32xf32>
    %144 = arith.subf %134, %143 : vector<32x32xf32>
    %145 = arith.mulf %144, %144 : vector<32x32xf32>
    %cst_51 = arith.constant dense<0.000000e+00> : vector<32xf32>
    %146 = vector.multi_reduction <add>, %145, %cst_51 [1] : vector<32x32xf32> to vector<32xf32>
    %147 = vector.shape_cast %146 : vector<32xf32> to vector<32x1xf32>
    %cst_52 = arith.constant 3.200000e+01 : f32
    %148 = vector.broadcast %cst_52 : f32 to vector<32x1xf32>
    %149 = arith.divf %147, %148 : vector<32x1xf32>
    %cst_53 = arith.constant 9.99999974E-6 : f32
    %150 = vector.broadcast %cst_53 : f32 to vector<32x1xf32>
    %151 = arith.addf %149, %150 : vector<32x1xf32>
    %152 = math.rsqrt %151 : vector<32x1xf32>
    %153 = vector.broadcast %152 : vector<32x1xf32> to vector<32x32xf32>
    %154 = arith.mulf %144, %153 : vector<32x32xf32>
    %155 = vector.broadcast %136 : vector<1x32xf32> to vector<32x32xf32>
    %156 = arith.mulf %154, %155 : vector<32x32xf32>
    %157 = vector.broadcast %138 : vector<1x32xf32> to vector<32x32xf32>
    %158 = arith.addf %156, %157 : vector<32x32xf32>
    %c0_54 = arith.constant 0 : index
    %c0_55 = arith.constant 0 : index
    %c0_56 = arith.constant 0 : index
    %159 = vector.load %arg10[%c0_54, %c0_55, %c0_56] : memref<1x32x64xf32, #tpu.memory_space<vmem>>, vector<1x32x64xf32>
    %160 = vector.shape_cast %159 : vector<1x32x64xf32> to vector<32x64xf32>
    %cst_57 = arith.constant dense<0.000000e+00> : vector<32x64xf32>
    %161 = tpu.matmul %158, %160, %cst_57 {dimension_numbers = #tpu.dot_dimension_numbers<[1], [0], [0], [1], [0, 0, 1, 1], [], []>} : vector<32x32xf32>, vector<32x64xf32>, vector<32x64xf32> -> vector<32x64xf32>
    %c0_58 = arith.constant 0 : index
    %c0_59 = arith.constant 0 : index
    %c0_60 = arith.constant 0 : index
    %162 = vector.load %arg11[%c0_58, %c0_59, %c0_60] : memref<1x1x64xf32, #tpu.memory_space<vmem>>, vector<1x1x64xf32>
    %163 = vector.shape_cast %162 : vector<1x1x64xf32> to vector<1x64xf32>
    %164 = vector.broadcast %163 : vector<1x64xf32> to vector<32x64xf32>
    %165 = arith.addf %161, %164 : vector<32x64xf32>
    %cst_61 = arith.constant 5.000000e-01 : f32
    %166 = vector.broadcast %cst_61 : f32 to vector<32x64xf32>
    %167 = arith.mulf %166, %165 : vector<32x64xf32>
    %cst_62 = arith.constant 0.707106769 : f32
    %168 = vector.broadcast %cst_62 : f32 to vector<32x64xf32>
    %169 = arith.mulf %165, %168 : vector<32x64xf32>
    %170 = math.absf %169 : vector<32x64xf32>
    %cst_63 = arith.constant 0.327591091 : f32
    %171 = vector.broadcast %cst_63 : f32 to vector<32x64xf32>
    %172 = arith.mulf %171, %170 : vector<32x64xf32>
    %cst_64 = arith.constant 1.000000e+00 : f32
    %173 = vector.broadcast %cst_64 : f32 to vector<32x64xf32>
    %174 = arith.addf %173, %172 : vector<32x64xf32>
    %175 = tpu.reciprocal %174 {approx = true} : vector<32x64xf32> -> vector<32x64xf32>
    %176 = arith.mulf %174, %175 : vector<32x64xf32>
    %cst_65 = arith.constant 2.000000e+00 : f32
    %177 = vector.broadcast %cst_65 : f32 to vector<32x64xf32>
    %178 = arith.subf %177, %176 : vector<32x64xf32>
    %179 = arith.mulf %175, %178 : vector<32x64xf32>
    %cst_66 = arith.constant 1.06140542 : f32
    %180 = vector.broadcast %cst_66 : f32 to vector<32x64xf32>
    %181 = arith.mulf %180, %179 : vector<32x64xf32>
    %cst_67 = arith.constant -1.45315206 : f32
    %182 = vector.broadcast %cst_67 : f32 to vector<32x64xf32>
    %183 = arith.addf %181, %182 : vector<32x64xf32>
    %184 = arith.mulf %183, %179 : vector<32x64xf32>
    %cst_68 = arith.constant 1.42141378 : f32
    %185 = vector.broadcast %cst_68 : f32 to vector<32x64xf32>
    %186 = arith.addf %184, %185 : vector<32x64xf32>
    %187 = arith.mulf %186, %179 : vector<32x64xf32>
    %cst_69 = arith.constant -0.284496725 : f32
    %188 = vector.broadcast %cst_69 : f32 to vector<32x64xf32>
    %189 = arith.addf %187, %188 : vector<32x64xf32>
    %190 = arith.mulf %189, %179 : vector<32x64xf32>
    %cst_70 = arith.constant 0.254829586 : f32
    %191 = vector.broadcast %cst_70 : f32 to vector<32x64xf32>
    %192 = arith.addf %190, %191 : vector<32x64xf32>
    %193 = arith.mulf %192, %179 : vector<32x64xf32>
    %cst_71 = arith.constant 0.000000e+00 : f32
    %194 = vector.broadcast %cst_71 : f32 to vector<32x64xf32>
    %195 = arith.subf %194, %170 : vector<32x64xf32>
    %196 = arith.mulf %195, %170 : vector<32x64xf32>
    %197 = math.exp %196 : vector<32x64xf32>
    %198 = arith.mulf %193, %197 : vector<32x64xf32>
    %cst_72 = arith.constant 1.000000e+00 : f32
    %199 = vector.broadcast %cst_72 : f32 to vector<32x64xf32>
    %200 = arith.subf %199, %198 : vector<32x64xf32>
    %cst_73 = arith.constant 0.000000e+00 : f32
    %201 = vector.broadcast %cst_73 : f32 to vector<32x64xf32>
    %202 = arith.cmpf oge, %169, %201 : vector<32x64xf32>
    %cst_74 = arith.constant 0.000000e+00 : f32
    %203 = vector.broadcast %cst_74 : f32 to vector<32x64xf32>
    %204 = arith.subf %203, %200 : vector<32x64xf32>
    %205 = arith.select %202, %200, %204 : vector<32x64xi1>, vector<32x64xf32>
    %cst_75 = arith.constant 1.000000e+00 : f32
    %206 = vector.broadcast %cst_75 : f32 to vector<32x64xf32>
    %207 = arith.addf %206, %205 : vector<32x64xf32>
    %208 = arith.mulf %167, %207 : vector<32x64xf32>
    %c0_76 = arith.constant 0 : index
    %c0_77 = arith.constant 0 : index
    %c0_78 = arith.constant 0 : index
    %209 = vector.load %arg12[%c0_76, %c0_77, %c0_78] : memref<1x64x32xf32, #tpu.memory_space<vmem>>, vector<1x64x32xf32>
    %210 = vector.shape_cast %209 : vector<1x64x32xf32> to vector<64x32xf32>
    %cst_79 = arith.constant dense<0.000000e+00> : vector<32x32xf32>
    %211 = tpu.matmul %208, %210, %cst_79 {dimension_numbers = #tpu.dot_dimension_numbers<[1], [0], [0], [1], [0, 0, 1, 1], [], []>} : vector<32x64xf32>, vector<64x32xf32>, vector<32x32xf32> -> vector<32x32xf32>
    %212 = arith.addf %134, %211 : vector<32x32xf32>
    %c0_80 = arith.constant 0 : index
    %c0_81 = arith.constant 0 : index
    %c0_82 = arith.constant 0 : index
    %213 = vector.load %arg13[%c0_80, %c0_81, %c0_82] : memref<1x1x32xf32, #tpu.memory_space<vmem>>, vector<1x1x32xf32>
    %214 = vector.shape_cast %213 : vector<1x1x32xf32> to vector<1x32xf32>
    %215 = vector.broadcast %214 : vector<1x32xf32> to vector<32x32xf32>
    %216 = arith.addf %212, %215 : vector<32x32xf32>
    %c0_83 = arith.constant 0 : index
    %c0_84 = arith.constant 0 : index
    %217 = vector.load %arg15[%c0_83, %c0_84] : memref<32x32xf32, #tpu.memory_space<vmem>>, vector<32x32xf32>
    tpu.vector_store %arg15[%c0_83, %c0_84], %216 {strides = array<i32>} : memref<32x32xf32, #tpu.memory_space<vmem>>, vector<32x32xf32>,
    %c1_i32 = arith.constant 1 : i32
    %218 = arith.cmpi eq, %arg1, %c1_i32 : i32
    %219 = arith.extui %218 : i1 to i32
    %c0_i32_85 = arith.constant 0 : i32
    %220 = arith.cmpi ne, %219, %c0_i32_85 : i32
    scf.if %220 {
      %c0_86 = arith.constant 0 : index
      %c0_87 = arith.constant 0 : index
      %221 = vector.load %arg14[%c0_86, %c0_87] : memref<32x32xf32, #tpu.memory_space<vmem>>, vector<32x32xf32>
      tpu.vector_store %arg14[%c0_86, %c0_87], %216 {strides = array<i32>} : memref<32x32xf32, #tpu.memory_space<vmem>>, vector<32x32xf32>,
    } else {
    }
    return
  }
  func.func @transform_0(%arg0: i32, %arg1: i32) -> (i32, i32) {
    %c0_i32 = arith.constant 0 : i32
    %c0_i32_0 = arith.constant 0 : i32
    return %arg0, %c0_i32 : i32, i32
  }
  func.func @transform_1(%arg0: i32, %arg1: i32) -> (i32, i32, i32) {
    %c0_i32 = arith.constant 0 : i32
    %c0_i32_0 = arith.constant 0 : i32
    %c0_i32_1 = arith.constant 0 : i32
    return %arg1, %c0_i32, %c0_i32_0 : i32, i32, i32
  }
  func.func @transform_2(%arg0: i32, %arg1: i32) -> (i32, i32, i32) {
    %c0_i32 = arith.constant 0 : i32
    %c0_i32_0 = arith.constant 0 : i32
    %c0_i32_1 = arith.constant 0 : i32
    return %arg1, %c0_i32, %c0_i32_0 : i32, i32, i32
  }
  func.func @transform_3(%arg0: i32, %arg1: i32) -> (i32, i32, i32) {
    %c0_i32 = arith.constant 0 : i32
    %c0_i32_0 = arith.constant 0 : i32
    %c0_i32_1 = arith.constant 0 : i32
    return %arg1, %c0_i32, %c0_i32_0 : i32, i32, i32
  }
  func.func @transform_4(%arg0: i32, %arg1: i32) -> (i32, i32, i32) {
    %c0_i32 = arith.constant 0 : i32
    %c0_i32_0 = arith.constant 0 : i32
    %c0_i32_1 = arith.constant 0 : i32
    return %arg1, %c0_i32, %c0_i32_0 : i32, i32, i32
  }
  func.func @transform_5(%arg0: i32, %arg1: i32) -> (i32, i32, i32) {
    %c0_i32 = arith.constant 0 : i32
    %c0_i32_0 = arith.constant 0 : i32
    %c0_i32_1 = arith.constant 0 : i32
    return %arg1, %c0_i32, %c0_i32_0 : i32, i32, i32
  }
  func.func @transform_6(%arg0: i32, %arg1: i32) -> (i32, i32, i32) {
    %c0_i32 = arith.constant 0 : i32
    %c0_i32_0 = arith.constant 0 : i32
    %c0_i32_1 = arith.constant 0 : i32
    return %arg1, %c0_i32, %c0_i32_0 : i32, i32, i32
  }
  func.func @transform_7(%arg0: i32, %arg1: i32) -> (i32, i32, i32) {
    %c0_i32 = arith.constant 0 : i32
    %c0_i32_0 = arith.constant 0 : i32
    %c0_i32_1 = arith.constant 0 : i32
    return %arg1, %c0_i32, %c0_i32_0 : i32, i32, i32
  }
  func.func @transform_8(%arg0: i32, %arg1: i32) -> (i32, i32, i32) {
    %c0_i32 = arith.constant 0 : i32
    %c0_i32_0 = arith.constant 0 : i32
    %c0_i32_1 = arith.constant 0 : i32
    return %arg1, %c0_i32, %c0_i32_0 : i32, i32, i32
  }
  func.func @transform_9(%arg0: i32, %arg1: i32) -> (i32, i32, i32) {
    %c0_i32 = arith.constant 0 : i32
    %c0_i32_0 = arith.constant 0 : i32
    %c0_i32_1 = arith.constant 0 : i32
    return %arg1, %c0_i32, %c0_i32_0 : i32, i32, i32
  }
  func.func @transform_10(%arg0: i32, %arg1: i32) -> (i32, i32, i32) {
    %c0_i32 = arith.constant 0 : i32
    %c0_i32_0 = arith.constant 0 : i32
    %c0_i32_1 = arith.constant 0 : i32
    return %arg1, %c0_i32, %c0_i32_0 : i32, i32, i32
  }
  func.func @transform_11(%arg0: i32, %arg1: i32) -> (i32, i32, i32) {
    %c0_i32 = arith.constant 0 : i32
    %c0_i32_0 = arith.constant 0 : i32
    %c0_i32_1 = arith.constant 0 : i32
    return %arg1, %c0_i32, %c0_i32_0 : i32, i32, i32
  }
  func.func @transform_12(%arg0: i32, %arg1: i32) -> (i32, i32) {
    %c0_i32 = arith.constant 0 : i32
    %c0_i32_0 = arith.constant 0 : i32
    return %arg0, %c0_i32 : i32, i32
  }
}

</mosaic_0001>

<bundles_post_ra>
// kernel: tpu_custom_call.1
= control target key start
LH: loop header
LB: loop body
LE: loop exit
PB: predicated region body
PF: predicated region fallthrough
CT: control target
= control target key end

     0   :  { %s4959_s21 = smov 0   ;;  %s4961_s22 = smov 0   ;;  %s5555_s0 = inlined_call_operand.vmem [shape: f32[64,32], index: 0, kind: input, shape index: {}]   ;;  %s5556_s1 = inlined_call_operand.vmem [shape: f32[2,1,32], index: 1, kind: input, shape index: {}]   ;;  %s5557_s2 = inlined_call_operand.vmem [shape: f32[2,1,32], index: 2, kind: input, shape index: {}]   ;;  %s5558_s3 = inlined_call_operand.vmem [shape: f32[2,32,192], index: 3, kind: input, shape index: {}]   ;;  %s5559_s4 = inlined_call_operand.vmem [shape: f32[2,64,32], index: 4, kind: input, shape index: {}]   ;;  %s5560_s5 = inlined_call_operand.vmem [shape: f32[2,1,32], index: 5, kind: input, shape index: {}]   ;;  %s5561_s6 = inlined_call_operand.vmem [shape: f32[2,1,32], index: 6, kind: input, shape index: {}]   ;;  %s5562_s7 = inlined_call_operand.vmem [shape: f32[2,1,32], index: 7, kind: input, shape index: {}]   ;;  %s5563_s8 = inlined_call_operand.vmem [shape: f32[2,32,64], index: 8, kind: input, shape index: {}]   ;;  %s5564_s9 = inlined_call_operand.vmem [shape: f32[2,1,64], index: 9, kind: input, shape index: {}]   ;;  %s5565_s10 = inlined_call_operand.vmem [shape: f32[2,64,32], index: 10, kind: input, shape index: {}]   ;;  %s5566_s11 = inlined_call_operand.vmem [shape: f32[2,1,32], index: 11, kind: input, shape index: {}]   ;;  %s5567_s12 = inlined_call_operand.vmem [shape: f32[64,32], index: 12, kind: output, shape index: {}]  }
   0x1   :  { %5572 = sst [smem:[#allocation9_spill]] %s5555_s0  ;;  %s4963_s23 = smov 0  }
   0x2   :  { %5573 = sst [smem:[#allocation10_spill]] %s5557_s2  ;;  %s4965_s24 = smov 0  }
   0x3   :  { %5574 = sst [smem:[#allocation11_spill]] %s5558_s3  ;;  %s4967_s25 = smov 0  }
   0x4   :  { %5575 = sst [smem:[#allocation12_spill]] %s5559_s4 }
   0x5 LB: > { %5576 = sst [smem:[#allocation3_spill]] %s4867_s21  ;;  %s31_s26 = sadd.s32 1, %s4875_s23  ;;  %s4883_s25 = sphi %s4967_s25, %s22_s25   ;;  %s4879_s24 = sphi %s4965_s24, %s5598_s24   ;;  %s4875_s23 = sphi %s4963_s23, %s5597_s23   ;;  %s4871_s22 = sphi %s4961_s22, %s5596_s22   ;;  %s4867_s21 = sphi %s4959_s21, %s5595_s21  }
   0x6   : > { %5577 = sst [smem:[#allocation4_spill]] %s4875_s23  ;;  %s34_s27 = sadd.s32 1, %s4879_s24 }
   0x7   : > { %5578 = sst [smem:[#allocation5_spill]] %s4879_s24  ;;  %p32_p0 = scmp.ge.s32.totalorder %s31_s26, 2 }
   0x8   : > { %5579 = sst [smem:[#allocation6_spill]] %s4883_s25  ;;  %p4282_p1 = scmp.ge.s32.totalorder %s4883_s25, 1 }
   0x9   : > { %p471_p2 = scmp.lt.s32.totalorder %s4883_s25, 5  ;;  %s5600_s26 = smov (%p32_p0, %s31_s26), 0 }
   0xa   : > { %5580 = sst [smem:[#allocation7_spill]] %s5600_s26  ;;  %s5602_s27 = smov (!%p32_p0, %s34_s27), %s4879_s24 }
   0xb   : > { %p472_p3 = pnand %p4282_p1, %p471_p2  ;;  %p36_p4 = scmp.ge.s32.totalorder %s5602_s27, 2 }
   0xc   : > { %s4283_s28 = sshll.u32 (!%p472_p3), %s4871_s22, 2  ;;  %p560_p5 = scmp.lt.s32.totalorder (!%p472_p3), %s4867_s21, 1 }
   0xd   : > { %s5604_s27 = smov (%p36_p4, %s5602_s27), 0  ;;  %475 = sbr.rel (%p472_p3) target bundleno = 4223 (0x107f), region = 68 }
   0xe   : > { %5581 = sst [smem:[#allocation8_spill]] %s5604_s27  ;;  %p555_p6 = scmp.lt.s32.totalorder (!%p472_p3), %s4283_s28, 7 }
   0xf   : > { %s5583_s0 = sld [smem:[#allocation9_spill]] (!%p472_p3) }
  0x10   : > { %s5584_s3 = sld [smem:[#allocation11_spill]] (!%p472_p3) }
  0x11   : > { %s5585_s4 = sld [smem:[#allocation12_spill]] (!%p472_p3) }
  0x12   : > { %s4993_s29 = scalar_select %p560_p5, %s4867_s21, 1 }
  0x13   : > { %s5606_s28 = smov (!%p555_p6, %s4283_s28), 7 }
  0x14   : > { %s4284_s18 = sshll.u32 %s5606_s28, 3  ;;  %s4370_s19 = sshll.u32 %s4993_s29, 6 }
  0x15   : > { %s558_s27 = scalar_lea.vmem %s5583_s0, %s4284_s18  ;;  %s4372_s24 = sshll.u32 %s4993_s29, 5 }
  0x16   : > { %s5010_s23 = scalar_lea.vmem %s5584_s3, %s4370_s19  ;;  %s592_s2 = scalar_lea.vmem %s5564_s9, %s4993_s29 }
  0x17   : > { %s5015_s30 = scalar_lea.vmem %s5585_s4, %s4370_s19  ;;  %s5037_s4 = scalar_lea.vmem %s5563_s8, %s4372_s24 }
  0x18   : > { %s5042_s15 = scalar_lea.vmem %s5565_s10, %s4370_s19  ;;  %s600_s20 = scalar_lea.vmem %s5566_s11, %s4993_s29 }
  0x19   : > { %s5051_s17 = scalar_lea.vmem %s5567_s12, %s4284_s18  ;;  %s5586_s3 = sld [smem:[#allocation3_spill]] }
  0x1f   : > { %p4295_p7 = scmp.ne.s32.totalorder %s5586_s3, 0 }
  0x21   : > { %610 = sbr.rel (%p4295_p7) target bundleno = 41 (0x29), region = 72 }
  0x26   : > { %v611_v0 = vld [vmem:[%s558_s27] sm:$0xff]  ;;  %vm615_vm0 = vcmask 261120   ;;  %v612_v1 = vld [vmem:[%s558_s27 + $0x8] sm:$0xff]  ;;  %v613_v2 = vld [vmem:[%s558_s27 + $0x10] sm:$0xff] }
  0x27   : > { %616 = vst.msk [vmem:[#allocation2] sm:$0xff] %vm615_vm0, %v611_v0  ;;  %617 = vst.msk [vmem:[#allocation2 + $0x8] sm:$0xff] %vm615_vm0, %v612_v1  ;;  %v614_v3 = vld [vmem:[%s558_s27 + $0x18] sm:$0xff] }
  0x28   : > { %618 = vst.msk [vmem:[#allocation2 + $0x10] sm:$0xff] %vm615_vm0, %v613_v2  ;;  %619 = vst.msk [vmem:[#allocation2 + $0x18] sm:$0xff] %vm615_vm0, %v614_v3 }
  0x29 PF: > { %vm626_vm1 = vcmask 261120   ;;  %v707_v32 = vld [vmem:[%s5010_s23 + $0x38] sm:$0xff]  ;;  %v706_v33 = vld [vmem:[%s5010_s23 + $0x30] sm:$0xff]  ;;  %v705_v34 = vld [vmem:[%s5010_s23 + $0x28] sm:$0xff]  ;;  %v4885_v36 = vmov 0.0   ;;  %s5587_s27 = scalar_lea.vmem %s5556_s1, %s4993_s29  ;;  %s5588_s24 = sld [smem:[#allocation10_spill]] }
  0x2a   : > { %744 = vmatprep.subr.mxu0 %v707_v32  ;;  %v704_v35 = vld [vmem:[%s5010_s23 + $0x20] sm:$0xff]  ;;  %784 = vmatprep.mubr.f32.mxu0 %v4885_v36  ;;  %v703_v37 = vld [vmem:[%s5010_s23 + $0x18] sm:$0xff]  ;;  %v702_v38 = vld [vmem:[%s5010_s23 + $0x10] sm:$0xff]  ;;  %vm4886_vm2 = vmmov 0   ;;  %s4887_s21 = smov 64   ;;  %vm812_vm3 = vcmask 130048   ;;  %s5590_s0 = scalar_lea.vmem %s5560_s5, %s4993_s29 }
  0x2b   : > { %745 = vmatpush1.msra.mxu0 %v706_v33  ;;  %4688 = vmatprep.subr.mxu1 %v707_v32  ;;  %v701_v39 = vld [vmem:[%s5010_s23 + $0x8] sm:$0xff]  ;;  %v700_v40 = vld [vmem:[%s5010_s23] sm:$0xff]  ;;  %vm1118_vm4 = vcmask 64512   ;;  %s4888_s25 = smov 48   ;;  %s4889_s14 = smov 112   ;;  %vm3543_vm5 = vcmask 392192  }
  0x2c   : > { %746 = vmatprep.subr.mxu0 %v705_v34  ;;  %4692 = vmatpush1.msra.mxu1 %v706_v33  ;;  %v4296_v54 = vld [vmem:[%s5587_s27] ss:$0 sm:$0xff]  ;;  %s4890_s13 = smov 32   ;;  %s4891_s28 = smov 96   ;;  %vm3556_vm6 = vcmask 523264  }
  0x2d   : > { %747 = vmatpush1.msra.mxu0 %v704_v35  ;;  %4689 = vmatprep.subr.mxu1 %v705_v34  ;;  %s4892_s16 = smov 16   ;;  %s4893_s22 = smov 80  }
  0x2e   : > { %v620_v4 = vld [vmem:[#allocation2] sm:$0xff]  ;;  %v621_v6 = vld [vmem:[#allocation2 + $0x8] sm:$0xff]  ;;  %748 = vmatprep.subr.mxu0 %v703_v37  ;;  %4693 = vmatpush1.msra.mxu1 %v704_v35  ;;  %s5591_s27 = scalar_lea.vmem %s5561_s6, %s4993_s29 }
  0x2f   : > { %v622_v5 = vld [vmem:[#allocation2 + $0x10] sm:$0xff]  ;;  %v627_v7 = vsel %vm626_vm1, %v620_v4, 0.0  ;;  %v623_v9 = vld [vmem:[#allocation2 + $0x18] sm:$0xff]  ;;  %v630_v10 = vsel %vm626_vm1, %v621_v6, 0.0  ;;  %749 = vmatpush1.msra.mxu0 %v702_v38  ;;  %4690 = vmatprep.subr.mxu1 %v703_v37  ;;  %s5589_s26 = scalar_lea.vmem %s5588_s24, %s4993_s29  ;;  %s5592_s24 = scalar_lea.vmem %s5562_s7, %s4993_s29 }
  0x30   : > { %v633_v8 = vsel %vm626_vm1, %v622_v5, 0.0  ;;  %628 = vadd.xlane.f32.xlu0 %v627_v7  ;;  %v636_v11 = vsel %vm626_vm1, %v623_v9, 0.0  ;;  %750 = vmatprep.subr.mxu0 %v701_v39  ;;  %v4297_v56 = vld [vmem:[%s5589_s26] ss:$0 sm:$0xff]  ;;  %s5593_s29 = sld [smem:[#allocation3_spill]] }
  0x31   : > { %634 = vadd.xlane.f32.xlu1 %v633_v8  ;;  %4694 = vmatpush1.msra.mxu1 %v702_v38 }
  0x32   : > { %751 = vmatpush1.msra.mxu0 %v700_v40  ;;  %4691 = vmatprep.subr.mxu1 %v701_v39 }
  0x33   : > { %4695 = vmatpush1.msra.mxu1 %v700_v40  ;;  %802 = vmatprep.mubr.f32.mxu1 %v4885_v36 }
  0x34   : > { %631 = vadd.xlane.f32.xlu0 %v630_v10  ;;  %4495 = vmatprep.subr.mxu0 %v4885_v36 }
  0x35   : > { %637 = vadd.xlane.f32.xlu1 %v636_v11  ;;  %4470 = vmatprep.subr.mxu1 %v4885_v36 }
  0x36   : > { %p4367_p8 = scmp.ne.s32.totalorder %s5593_s29, 1 }
  0xb9   : > { %v629_v12 = vpop.xlane.xlu0 %628 }
  0xba   : > { %v635_v13 = vpop.xlane.xlu1 %634  ;;  %v640_v14 = vmul.f32 0.03125, %v629_v12 }
  0xbb   : > { %v642_v15 = vmul.f32 0.03125, %v635_v13 }
  0xbc   : > { %v5058_v16 = vsub.f32 %v620_v4, %v640_v14 }
  0xbd   : > { %v5060_v17 = vsub.f32 %v622_v5, %v642_v15  ;;  %v632_v18 = vpop.xlane.xlu0 %631 }
  0xbe   : > { %v638_v19 = vpop.xlane.xlu1 %637  ;;  %v641_v20 = vmul.f32 0.03125, %v632_v18  ;;  %v648_v22 = vmul.f32 %v5058_v16, %v5058_v16 }
  0xbf   : > { %v643_v21 = vmul.f32 0.03125, %v638_v19  ;;  %v650_v23 = vmul.f32 %v5060_v17, %v5060_v17 }
  0xc0   : > { %v5066_v24 = vsub.f32 %v621_v6, %v641_v20  ;;  %v652_v26 = vsel %vm626_vm1, %v648_v22, 0.0 }
  0xc1   : > { %v5068_v25 = vsub.f32 %v623_v9, %v643_v21  ;;  %653 = vadd.xlane.f32.xlu0 %v652_v26  ;;  %v658_v27 = vsel %vm626_vm1, %v650_v23, 0.0 }
  0xc2   : > { %v649_v28 = vmul.f32 %v5066_v24, %v5066_v24 }
  0xc3   : > { %v651_v29 = vmul.f32 %v5068_v25, %v5068_v25 }
  0xc4   : > { %v655_v30 = vsel %vm626_vm1, %v649_v28, 0.0 }
  0xc5   : > { %659 = vadd.xlane.f32.xlu0 %v658_v27  ;;  %656 = vadd.xlane.f32.xlu1 %v655_v30  ;;  %v661_v31 = vsel %vm626_vm1, %v651_v29, 0.0 }
  0xc9   : > { %662 = vadd.xlane.f32.xlu1 %v661_v31 }
 0x14a   : > { %v654_v41 = vpop.xlane.xlu0 %653 }
 0x14b   : > { %v664_v42 = vmul.f32 0.03125, %v654_v41 }
 0x14d   : > { %v668_v43 = vadd.f32 1e-05, %v664_v42 }
 0x14e   : > { %v657_v44 = vpop.xlane.xlu1 %656  ;;  %v660_v45 = vpop.xlane.xlu0 %659 }
 0x14f   : > { %4745 = vrsqrt.f32 %v668_v43  ;;  %v665_v46 = vmul.f32 0.03125, %v657_v44  ;;  %v666_v47 = vmul.f32 0.03125, %v660_v45 }
 0x151   : > { %v669_v48 = vadd.f32 1e-05, %v665_v46  ;;  %v670_v49 = vadd.f32 1e-05, %v666_v47 }
 0x152   : > { %v663_v50 = vpop.xlane.xlu1 %662 }
 0x153   : > { %4747 = vrsqrt.f32 %v669_v48  ;;  %v667_v51 = vmul.f32 0.03125, %v663_v50 }
 0x154   : > { %4749 = vrsqrt.f32 %v670_v49 }
 0x155   : > { %v671_v52 = vadd.f32 1e-05, %v667_v51 }
 0x157   : > { %4751 = vrsqrt.f32 %v671_v52 }
 0x15c   : > { %v4746_v53 = vpop.eup %4745 }
 0x15d   : > { %v676_v55 = vmul.f32 %v4746_v53, %v5058_v16 }
 0x15f   : > { %v686_v57 = vmul.f32 %v4296_v54, %v676_v55 }
 0x160   : > { %v4748_v58 = vpop.eup %4747 }
 0x161   : > { %v4750_v59 = vpop.eup %4749  ;;  %v696_v60 = vadd.f32 %v4297_v56, %v686_v57  ;;  %v677_v61 = vmul.f32 %v4748_v58, %v5066_v24 }
 0x162   : > { %v678_v62 = vmul.f32 %v4750_v59, %v5060_v17 }
 0x163   : > { %4298 = vmatmul.mubr.msk.f32.vlgmr.msra.gmra.mxu0 %vm626_vm1, %v696_v60  ;;  %v687_v63 = vmul.f32 %v4296_v54, %v677_v61 }
 0x164   : > { %v4752_v0 = vpop.eup %4751  ;;  %790 = vmatprep.mubr.f32.mxu0 %v4885_v36  ;;  %v688_v2 = vmul.f32 %v4296_v54, %v678_v62 }
 0x165   : > { %v697_v1 = vadd.f32 %v4297_v56, %v687_v63  ;;  %v679_v3 = vmul.f32 %v4752_v0, %v5068_v25 }
 0x166   : > { %v698_v5 = vadd.f32 %v4297_v56, %v688_v2 }
 0x167   : > { %4299 = vmatmul.mubr.msk.f32.gmra.mxu0 %vm626_vm1, %v697_v1  ;;  %v689_v4 = vmul.f32 %v4296_v54, %v679_v3 }
 0x168   : > { %796 = vmatprep.mubr.f32.mxu0 %v4885_v36 }
 0x169   : > { %v699_v6 = vadd.f32 %v4297_v56, %v689_v4 }
 0x16b   : > { %4300 = vmatmul.mubr.msk.f32.gmra.mxu0 %vm626_vm1, %v698_v5  ;;  %4301 = vmatmul.mubr.msk.f32.vlgmr.msra.gmra.mxu1 %vm626_vm1, %v699_v6 }
 0x16c   : > { %4472 = vmatprep.mubr.msk.f32.mxu1 %vm4886_vm2, %v4885_v36  ;;  %4497 = vmatprep.mubr.msk.f32.mxu0 %vm4886_vm2, %v4885_v36 }
 0x223   : > { %v5114_v7 = vpop.f32.mrf.mxu0 }
 0x224   : > { %810 = vrot.lane.b32.xlu0 %v5114_v7, %s4887_s21 }
 0x225   : > { %v5117_v8 = vpop.f32.mrf.mxu0 }
 0x227   : > { %v5119_v9 = vpop.f32.mrf.mxu0 }
 0x228   : > { %888 = vrot.lane.b32.xlu1 %v5119_v9, %s4887_s21 }
 0x229   : > { %v5122_v10 = vpop.f32.mrf.mxu0 }
 0x22a   : > { %4496 = vmatpush3.msra.mxu0 %v5122_v10 }
 0x22b   : > { %v5125_v11 = vpop.f32.mrf.mxu0  ;;  %4505 = vmatprep.subr.mxu0 %v4885_v36  ;;  %v5129_v12 = vpop.f32.mrf.mxu1 }
 0x22c   : > { %965 = vrot.lane.b32.xlu1 %v5125_v11, %s4887_s21 }
 0x22d   : > { %v5158_v17 = vpop.f32.mrf.mxu1  ;;  %v5184_v63 = vpop.f32.mrf.mxu0 }
 0x230   : > { %1042 = vrot.lane.b32.xlu1 %v5129_v12, %s4887_s21 }
 0x296   : > { %v811_v13 = vpop.permute.xlu0 %810 }
 0x297   : > { %4471 = vmatpush3.xpose.msk.msra.mxu1 %vm812_vm3, %v811_v13 }
 0x298   : > { %4475 = vmatprep.subr.mxu1 %v4885_v36 }
 0x29a   : > { %v889_v14 = vpop.permute.xlu1 %888  ;;  %4473 = vmatmul.mubr.msk.f32.vlgmr.msra.gmra.mxu1 %vm812_vm3, %v5114_v7 }
 0x29b   : > { %4476 = vmatpush3.xpose.msk.msra.mxu1 %vm812_vm3, %v889_v14  ;;  %4477 = vmatprep.mubr.msk.f32.mxu1 %vm4886_vm2, %v4885_v36 }
 0x29c   : > { %4480 = vmatprep.subr.mxu1 %v4885_v36 }
 0x29e   : > { %v966_v15 = vpop.permute.xlu1 %965  ;;  %4478 = vmatmul.mubr.msk.f32.vlgmr.msra.gmra.mxu1 %vm812_vm3, %v5119_v9 }
 0x29f   : > { %4481 = vmatpush3.xpose.msk.msra.mxu1 %vm812_vm3, %v966_v15  ;;  %4482 = vmatprep.mubr.msk.f32.mxu1 %vm4886_vm2, %v4885_v36 }
 0x2a0   : > { %4485 = vmatprep.subr.mxu1 %v4885_v36 }
 0x2a2   : > { %v1043_v16 = vpop.permute.xlu1 %1042  ;;  %4483 = vmatmul.mubr.msk.f32.vlgmr.msra.gmra.mxu1 %vm812_vm3, %v5125_v11 }
 0x2a3   : > { %4486 = vmatpush3.xpose.msk.msra.mxu1 %vm812_vm3, %v1043_v16  ;;  %4487 = vmatprep.mubr.msk.f32.mxu1 %vm4886_vm2, %v4885_v36 }
 0x2a4   : > { %4490 = vmatprep.subr.mxu1 %v4885_v36 }
 0x2a6   : > { %4488 = vmatmul.mubr.msk.f32.vlgmr.msra.gmra.mxu1 %vm812_vm3, %v5129_v12 }
 0x2a7   : > { %4491 = vmatpush3.msra.mxu1 %v5117_v8  ;;  %4492 = vmatprep.mubr.msk.f32.mxu1 %vm4886_vm2, %v4885_v36 }
 0x2a8   : > { %4500 = vmatprep.subr.mxu1 %v4885_v36 }
 0x35a   : > { %v883_v18 = vpop.f32.mrf.mxu1 }
 0x35b   : > { %v1119_v19 = vsel %vm1118_vm4, %v883_v18, -inf }
 0x35c   : > { %1120 = vmax.xlane.f32.xlu0 %v1119_v19  ;;  %v4474_v20 = vpop.f32.mrf.mxu1 }
 0x35e   : > { %v960_v21 = vpop.f32.mrf.mxu1 }
 0x35f   : > { %v1122_v22 = vsel %vm1118_vm4, %v960_v21, -inf }
 0x360   : > { %1123 = vmax.xlane.f32.xlu1 %v1122_v22  ;;  %v4479_v23 = vpop.f32.mrf.mxu1 }
 0x362   : > { %v1037_v24 = vpop.f32.mrf.mxu1 }
 0x363   : > { %v1125_v25 = vsel %vm1118_vm4, %v1037_v24, -inf }
 0x364   : > { %1126 = vmax.xlane.f32.xlu0 %v1125_v25  ;;  %v4484_v26 = vpop.f32.mrf.mxu1 }
 0x366   : > { %v1114_v27 = vpop.f32.mrf.mxu1 }
 0x367   : > { %v1128_v28 = vsel %vm1118_vm4, %v1114_v27, -inf }
 0x368   : > { %1129 = vmax.xlane.f32.xlu0 %v1128_v28  ;;  %v4489_v29 = vpop.f32.mrf.mxu1 }
 0x3e5   : > { %v1121_v30 = vpop.xlane.xlu0 %1120 }
 0x3e6   : > { %v1131_v31 = vsub.f32 %v883_v18, %v1121_v30 }
 0x3e8   : > { %v1135_v32 = vmul.f32 1.442695, %v1131_v31 }
 0x3e9   : > { %v1124_v33 = vpop.xlane.xlu1 %1123 }
 0x3ea   : > { %4753 = vpow2.f32 %v1135_v32  ;;  %v1132_v34 = vsub.f32 %v960_v21, %v1124_v33 }
 0x3ec   : > { %v1137_v35 = vmul.f32 1.442695, %v1132_v34 }
 0x3ed   : > { %v1127_v37 = vpop.xlane.xlu0 %1126 }
 0x3ee   : > { %4755 = vpow2.f32 %v1137_v35  ;;  %v1133_v38 = vsub.f32 %v1037_v24, %v1127_v37 }
 0x3f0   : > { %v1139_v39 = vmul.f32 1.442695, %v1133_v38 }
 0x3f1   : > { %v1130_v46 = vpop.xlane.xlu0 %1129 }
 0x3f2   : > { %4757 = vpow2.f32 %v1139_v39  ;;  %v1134_v47 = vsub.f32 %v1114_v27, %v1130_v46 }
 0x3f4   : > { %v1141_v48 = vmul.f32 1.442695, %v1134_v47 }
 0x3f6   : > { %4759 = vpow2.f32 %v1141_v48 }
 0x3f7   : > { %v4754_v40 = vpop.eup %4753 }
 0x3f8   : > { %v1143_v41 = vsel %vm1118_vm4, %v4754_v40, 0.0 }
 0x3f9   : > { %1144 = vadd.xlane.f32.xlu0 %v1143_v41 }
 0x3fb   : > { %v4756_v42 = vpop.eup %4755 }
 0x3fc   : > { %v1146_v43 = vsel %vm1118_vm4, %v4756_v42, 0.0 }
 0x3fd   : > { %1147 = vadd.xlane.f32.xlu1 %v1146_v43 }
 0x3ff   : > { %v4758_v44 = vpop.eup %4757 }
 0x400   : > { %v1149_v45 = vsel %vm1118_vm4, %v4758_v44, 0.0 }
 0x401   : > { %1150 = vadd.xlane.f32.xlu0 %v1149_v45 }
 0x403   : > { %v4760_v49 = vpop.eup %4759 }
 0x404   : > { %v1152_v50 = vsel %vm1118_vm4, %v4760_v49, 0.0 }
 0x40e   : > { %1547 = vrot.lane.b32.xlu1 %v5119_v9, %s4888_s25 }
 0x412   : > { %1467 = vrot.lane.b32.xlu1 %v5114_v7, %s4889_s14 }
 0x417   : > { %1469 = vrot.lane.b32.xlu0 %v5114_v7, %s4888_s25 }
 0x41b   : > { %1625 = vrot.lane.b32.xlu0 %v5125_v11, %s4888_s25 }
 0x41f   : > { %1623 = vrot.lane.b32.xlu0 %v5125_v11, %s4889_s14 }
 0x436   : > { %1153 = vadd.xlane.f32.xlu1 %v1152_v50 }
 0x447   : > { %1545 = vrot.lane.b32.xlu1 %v5119_v9, %s4889_s14 }
 0x44b   : > { %1703 = vrot.lane.b32.xlu1 %v5129_v12, %s4888_s25 }
 0x44f   : > { %1701 = vrot.lane.b32.xlu1 %v5129_v12, %s4889_s14 }
 0x482   : > { %v1145_v51 = vpop.xlane.xlu0 %1144 }
 0x483   : > { %4761 = vrcp.f32 %v1145_v51 }
 0x486   : > { %v1148_v52 = vpop.xlane.xlu1 %1147 }
 0x487   : > { %4763 = vrcp.f32 %v1148_v52 }
 0x48a   : > { %v1151_v53 = vpop.xlane.xlu0 %1150  ;;  %v1548_v6 = vpop.permute.xlu1 %1547 }
 0x48b   : > { %4765 = vrcp.f32 %v1151_v53 }
 0x48e   : > { %v1470_v4 = vpop.permute.xlu0 %1469  ;;  %v1468_v15 = vpop.permute.xlu1 %1467 }
 0x490   : > { %v4762_v54 = vpop.eup %4761 }
 0x491   : > { %v1159_v55 = vmul.f32 %v4762_v54, %v1145_v51 }
 0x492   : > { %v1626_v14 = vpop.permute.xlu0 %1625 }
 0x493   : > { %v1163_v56 = vsub.f32 2.0, %v1159_v55 }
 0x494   : > { %v4764_v57 = vpop.eup %4763 }
 0x495   : > { %v1167_v58 = vmul.f32 %v4762_v54, %v1163_v56  ;;  %v1160_v59 = vmul.f32 %v4764_v57, %v1148_v52 }
 0x496   : > { %v1624_v16 = vpop.permute.xlu0 %1623 }
 0x497   : > { %v1171_v60 = vmul.f32 %v4754_v40, %v1167_v58  ;;  %v1164_v61 = vsub.f32 2.0, %v1160_v59 }
 0x498   : > { %v4766_v62 = vpop.eup %4765 }
 0x499   : > { %v1168_v0 = vmul.f32 %v4764_v57, %v1164_v61  ;;  %v1161_v1 = vmul.f32 %v4766_v62, %v1151_v53  ;;  %4493 = vmatmul.mubr.msk.f32.vlgmr.msra.gmra.mxu1 %vm1118_vm4, %v1171_v60 }
 0x49a   : > { %4501 = vmatpush3.msra.mxu1 %v5184_v63  ;;  %4502 = vmatprep.mubr.msk.f32.mxu1 %vm4886_vm2, %v4885_v36 }
 0x49b   : > { %v1172_v2 = vmul.f32 %v4756_v42, %v1168_v0  ;;  %v1165_v3 = vsub.f32 2.0, %v1161_v1  ;;  %4510 = vmatprep.subr.mxu1 %v4885_v36 }
 0x49d   : > { %v1169_v5 = vmul.f32 %v4766_v62, %v1165_v3  ;;  %4498 = vmatmul.mubr.msk.f32.vlgmr.msra.gmra.mxu0 %vm1118_vm4, %v1172_v2 }
 0x49e   : > { %4506 = vmatpush3.msra.mxu0 %v5158_v17  ;;  %4507 = vmatprep.mubr.msk.f32.mxu0 %vm4886_vm2, %v4885_v36 }
 0x49f   : > { %v1173_v13 = vmul.f32 %v4758_v44, %v1169_v5  ;;  %4515 = vmatprep.subr.mxu0 %v4885_v36 }
 0x4a1   : > { %4503 = vmatmul.mubr.msk.f32.vlgmr.msra.gmra.mxu1 %vm1118_vm4, %v1173_v13 }
 0x4a2   : > { %4511 = vmatpush3.xpose.msk.msra.mxu1 %vm812_vm3, %v1470_v4  ;;  %4512 = vmatprep.mubr.msk.f32.mxu1 %vm4886_vm2, %v4885_v36 }
 0x4a3   : > { %4520 = vmatprep.subr.mxu1 %v4885_v36 }
 0x4a5   : > { %4513 = vmatmul.mubr.msk.f32.vlgmr.msra.gmra.mxu1 %vm812_vm3, %v1468_v15 }
 0x4a6   : > { %4521 = vmatpush3.xpose.msk.msra.mxu1 %vm812_vm3, %v1626_v14  ;;  %4522 = vmatprep.mubr.msk.f32.mxu1 %vm4886_vm2, %v4885_v36 }
 0x4a7   : > { %4530 = vmatprep.subr.mxu1 %v4885_v36 }
 0x4a9   : > { %4523 = vmatmul.mubr.msk.f32.vlgmr.msra.gmra.mxu1 %vm812_vm3, %v1624_v16 }
 0x4aa   : > { %4532 = vmatprep.mubr.msk.f32.mxu1 %vm4886_vm2, %v4885_v36 }
 0x4bf   : > { %v1154_v18 = vpop.xlane.xlu1 %1153 }
 0x4c0   : > { %4767 = vrcp.f32 %v1154_v18 }
 0x4c3   : > { %v1546_v22 = vpop.permute.xlu1 %1545 }
 0x4c7   : > { %v1704_v25 = vpop.permute.xlu1 %1703 }
 0x4cb   : > { %v1702_v26 = vpop.permute.xlu1 %1701 }
 0x4cd   : > { %v4768_v19 = vpop.eup %4767 }
 0x4ce   : > { %v1162_v20 = vmul.f32 %v4768_v19, %v1154_v18 }
 0x4d0   : > { %v1166_v21 = vsub.f32 2.0, %v1162_v20 }
 0x4d2   : > { %v1170_v23 = vmul.f32 %v4768_v19, %v1166_v21 }
 0x4d4   : > { %v1174_v24 = vmul.f32 %v4760_v49, %v1170_v23 }
 0x4d6   : > { %4508 = vmatmul.mubr.msk.f32.vlgmr.msra.gmra.mxu0 %vm1118_vm4, %v1174_v24 }
 0x4d7   : > { %4516 = vmatpush3.xpose.msk.msra.mxu0 %vm812_vm3, %v1548_v6  ;;  %4517 = vmatprep.mubr.msk.f32.mxu0 %vm4886_vm2, %v4885_v36 }
 0x4d8   : > { %4525 = vmatprep.subr.mxu0 %v4885_v36 }
 0x4da   : > { %4518 = vmatmul.mubr.msk.f32.vlgmr.msra.gmra.mxu0 %vm812_vm3, %v1546_v22 }
 0x4db   : > { %4526 = vmatpush3.xpose.msk.msra.mxu0 %vm812_vm3, %v1704_v25  ;;  %4527 = vmatprep.mubr.msk.f32.mxu0 %vm4886_vm2, %v4885_v36 }
 0x4dc   : > { %4535 = vmatprep.subr.mxu0 %v4885_v36 }
 0x4de   : > { %4528 = vmatmul.mubr.msk.f32.vlgmr.msra.gmra.mxu0 %vm812_vm3, %v1702_v26 }
 0x4df   : > { %4537 = vmatprep.mubr.msk.f32.mxu0 %vm4886_vm2, %v4885_v36 }
 0x559   : > { %v5222_v27 = vpop.f32.mrf.mxu1 }
 0x55b   : > { %v4494_v28 = vpop.f32.mrf.mxu1 }
 0x55d   : > { %v5224_v29 = vpop.f32.mrf.mxu0 }
 0x55f   : > { %v4499_v30 = vpop.f32.mrf.mxu0 }
 0x561   : > { %v5226_v31 = vpop.f32.mrf.mxu1 }
 0x563   : > { %v4504_v32 = vpop.f32.mrf.mxu1 }
 0x565   : > { %v1541_v33 = vpop.f32.mrf.mxu1 }
 0x566   : > { %v1779_v34 = vsel %vm1118_vm4, %v1541_v33, -inf }
 0x567   : > { %1780 = vmax.xlane.f32.xlu0 %v1779_v34  ;;  %v4514_v35 = vpop.f32.mrf.mxu1 }
 0x569   : > { %v1697_v37 = vpop.f32.mrf.mxu1 }
 0x56a   : > { %v1785_v38 = vsel %vm1118_vm4, %v1697_v37, -inf }
 0x56b   : > { %1786 = vmax.xlane.f32.xlu0 %v1785_v38  ;;  %v4524_v39 = vpop.f32.mrf.mxu1 }
 0x596   : > { %v5230_v40 = vpop.f32.mrf.mxu0 }
 0x598   : > { %v4509_v41 = vpop.f32.mrf.mxu0 }
 0x59a   : > { %v1619_v42 = vpop.f32.mrf.mxu0 }
 0x59b   : > { %v1782_v43 = vsel %vm1118_vm4, %v1619_v42, -inf }
 0x59c   : > { %1783 = vmax.xlane.f32.xlu1 %v1782_v43  ;;  %v4519_v44 = vpop.f32.mrf.mxu0 }
 0x59e   : > { %v1775_v45 = vpop.f32.mrf.mxu0 }
 0x59f   : > { %v1788_v46 = vsel %vm1118_vm4, %v1775_v45, -inf }
 0x5a0   : > { %v4529_v47 = vpop.f32.mrf.mxu0  ;;  %1789 = vmax.xlane.f32.xlu0 %v1788_v46 }
 0x5ad   : > { %1913 = vrot.lane.b32.xlu1 %v5122_v10, %s4889_s14 }
 0x5b1   : > { %1990 = vrot.lane.b32.xlu1 %v5184_v63, %s4889_s14 }
 0x5b5   : > { %2067 = vrot.lane.b32.xlu1 %v5158_v17, %s4889_s14 }
 0x5b6   : > { %1836 = vrot.lane.b32.xlu0 %v5117_v8, %s4889_s14 }
 0x5f0   : > { %v1781_v48 = vpop.xlane.xlu0 %1780 }
 0x5f1   : > { %v1791_v49 = vsub.f32 %v1541_v33, %v1781_v48 }
 0x5f3   : > { %v1795_v50 = vmul.f32 1.442695, %v1791_v49 }
 0x5f4   : > { %v1787_v51 = vpop.xlane.xlu0 %1786 }
 0x5f5   : > { %4769 = vpow2.f32 %v1795_v50  ;;  %v1793_v52 = vsub.f32 %v1697_v37, %v1787_v51 }
 0x5f7   : > { %v1799_v53 = vmul.f32 1.442695, %v1793_v52 }
 0x5f9   : > { %4771 = vpow2.f32 %v1799_v53 }
 0x602   : > { %v4770_v54 = vpop.eup %4769 }
 0x603   : > { %v1803_v55 = vsel %vm1118_vm4, %v4770_v54, 0.0 }
 0x604   : > { %1804 = vadd.xlane.f32.xlu0 %v1803_v55 }
 0x606   : > { %v4772_v56 = vpop.eup %4771 }
 0x607   : > { %v1809_v57 = vsel %vm1118_vm4, %v4772_v56, 0.0 }
 0x608   : > { %1810 = vadd.xlane.f32.xlu0 %v1809_v57 }
 0x61e   : > { %2145 = vrot.lane.b32.xlu0 %v5114_v7, %s4890_s13 }
 0x622   : > { %2143 = vrot.lane.b32.xlu0 %v5114_v7, %s4891_s28 }
 0x625   : > { %v1784_v58 = vpop.xlane.xlu1 %1783 }
 0x626   : > { %v1792_v59 = vsub.f32 %v1619_v42, %v1784_v58  ;;  %2301 = vrot.lane.b32.xlu0 %v5125_v11, %s4890_s13 }
 0x628   : > { %v1797_v60 = vmul.f32 1.442695, %v1792_v59 }
 0x629   : > { %v1914_v61 = vpop.permute.xlu1 %1913  ;;  %v1790_v62 = vpop.xlane.xlu0 %1789 }
 0x62a   : > { %4773 = vpow2.f32 %v1797_v60  ;;  %4536 = vmatpush3.msra.mxu0 %v1914_v61  ;;  %2299 = vrot.lane.b32.xlu0 %v5125_v11, %s4891_s28  ;;  %v1794_v3 = vsub.f32 %v1775_v45, %v1790_v62 }
 0x62b   : > { %4545 = vmatprep.subr.mxu0 %v4885_v36 }
 0x62c   : > { %v1801_v4 = vmul.f32 1.442695, %v1794_v3 }
 0x62d   : > { %v1837_v0 = vpop.permute.xlu0 %1836  ;;  %v1991_v26 = vpop.permute.xlu1 %1990 }
 0x62e   : > { %4531 = vmatpush3.msra.mxu1 %v1837_v0  ;;  %4775 = vpow2.f32 %v1801_v4 }
 0x62f   : > { %4540 = vmatprep.subr.mxu1 %v4885_v36 }
 0x631   : > { %v2068_v34 = vpop.permute.xlu1 %2067 }
 0x637   : > { %v4774_v1 = vpop.eup %4773 }
 0x638   : > { %v1806_v2 = vsel %vm1118_vm4, %v4774_v1, 0.0 }
 0x639   : > { %1807 = vadd.xlane.f32.xlu1 %v1806_v2 }
 0x63b   : > { %v4776_v5 = vpop.eup %4775 }
 0x63c   : > { %v1812_v6 = vsel %vm1118_vm4, %v4776_v5, 0.0 }
 0x64a   : > { %2223 = vrot.lane.b32.xlu1 %v5119_v9, %s4890_s13 }
 0x66e   : > { %1813 = vadd.xlane.f32.xlu1 %v1812_v6 }
 0x67f   : > { %2221 = vrot.lane.b32.xlu1 %v5119_v9, %s4891_s28 }
 0x683   : > { %2379 = vrot.lane.b32.xlu1 %v5129_v12, %s4890_s13 }
 0x687   : > { %2377 = vrot.lane.b32.xlu1 %v5129_v12, %s4891_s28 }
 0x68d   : > { %v1805_v13 = vpop.xlane.xlu0 %1804 }
 0x68e   : > { %4777 = vrcp.f32 %v1805_v13 }
 0x691   : > { %v1811_v14 = vpop.xlane.xlu0 %1810 }
 0x692   : > { %4779 = vrcp.f32 %v1811_v14 }
 0x695   : > { %v2146_v18 = vpop.permute.xlu0 %2145 }
 0x699   : > { %v2144_v25 = vpop.permute.xlu0 %2143 }
 0x69b   : > { %v4778_v15 = vpop.eup %4777 }
 0x69c   : > { %v1819_v16 = vmul.f32 %v4778_v15, %v1805_v13 }
 0x69d   : > { %v2302_v32 = vpop.permute.xlu0 %2301 }
 0x69e   : > { %v1823_v19 = vsub.f32 2.0, %v1819_v16 }
 0x69f   : > { %v4780_v20 = vpop.eup %4779 }
 0x6a0   : > { %v1827_v21 = vmul.f32 %v4778_v15, %v1823_v19  ;;  %v1821_v22 = vmul.f32 %v4780_v20, %v1811_v14 }
 0x6a1   : > { %v2300_v33 = vpop.permute.xlu0 %2299 }
 0x6a2   : > { %v1831_v23 = vmul.f32 %v4770_v54, %v1827_v21  ;;  %v1825_v24 = vsub.f32 2.0, %v1821_v22 }
 0x6a4   : > { %v1829_v28 = vmul.f32 %v4780_v20, %v1825_v24  ;;  %4533 = vmatmul.mubr.msk.f32.vlgmr.msra.gmra.mxu1 %vm1118_vm4, %v1831_v23 }
 0x6a5   : > { %4541 = vmatpush3.msra.mxu1 %v1991_v26  ;;  %4542 = vmatprep.mubr.msk.f32.mxu1 %vm4886_vm2, %v4885_v36 }
 0x6a6   : > { %v1833_v30 = vmul.f32 %v4772_v56, %v1829_v28  ;;  %4550 = vmatprep.subr.mxu1 %v4885_v36 }
 0x6a8   : > { %4543 = vmatmul.mubr.msk.f32.vlgmr.msra.gmra.mxu1 %vm1118_vm4, %v1833_v30 }
 0x6a9   : > { %4551 = vmatpush3.xpose.msk.msra.mxu1 %vm812_vm3, %v2146_v18  ;;  %4552 = vmatprep.mubr.msk.f32.mxu1 %vm4886_vm2, %v4885_v36 }
 0x6aa   : > { %4560 = vmatprep.subr.mxu1 %v4885_v36 }
 0x6ac   : > { %4553 = vmatmul.mubr.msk.f32.vlgmr.msra.gmra.mxu1 %vm812_vm3, %v2144_v25 }
 0x6ad   : > { %4561 = vmatpush3.xpose.msk.msra.mxu1 %vm812_vm3, %v2302_v32  ;;  %4562 = vmatprep.mubr.msk.f32.mxu1 %vm4886_vm2, %v4885_v36 }
 0x6ae   : > { %4570 = vmatprep.subr.mxu1 %v4885_v36 }
 0x6b0   : > { %4563 = vmatmul.mubr.msk.f32.vlgmr.msra.gmra.mxu1 %vm812_vm3, %v2300_v33 }
 0x6b1   : > { %4572 = vmatprep.mubr.msk.f32.mxu1 %vm4886_vm2, %v4885_v36 }
 0x6c2   : > { %v1808_v35 = vpop.xlane.xlu1 %1807 }
 0x6c3   : > { %4781 = vrcp.f32 %v1808_v35 }
 0x6c6   : > { %v2224_v43 = vpop.permute.xlu1 %2223 }
 0x6d0   : > { %v4782_v37 = vpop.eup %4781 }
 0x6d1   : > { %v1820_v38 = vmul.f32 %v4782_v37, %v1808_v35 }
 0x6d3   : > { %v1824_v39 = vsub.f32 2.0, %v1820_v38 }
 0x6d5   : > { %v1828_v41 = vmul.f32 %v4782_v37, %v1824_v39 }
 0x6d7   : > { %v1832_v42 = vmul.f32 %v4774_v1, %v1828_v41 }
 0x6d9   : > { %4538 = vmatmul.mubr.msk.f32.vlgmr.msra.gmra.mxu0 %vm1118_vm4, %v1832_v42 }
 0x6da   : > { %4546 = vmatpush3.msra.mxu0 %v2068_v34  ;;  %4547 = vmatprep.mubr.msk.f32.mxu0 %vm4886_vm2, %v4885_v36 }
 0x6db   : > { %4555 = vmatprep.subr.mxu0 %v4885_v36 }
 0x6f7   : > { %v1814_v44 = vpop.xlane.xlu1 %1813 }
 0x6f8   : > { %4783 = vrcp.f32 %v1814_v44 }
 0x6fb   : > { %v2222_v48 = vpop.permute.xlu1 %2221 }
 0x6ff   : > { %v2380_v51 = vpop.permute.xlu1 %2379 }
 0x703   : > { %v2378_v52 = vpop.permute.xlu1 %2377 }
 0x705   : > { %v4784_v45 = vpop.eup %4783 }
 0x706   : > { %v1822_v46 = vmul.f32 %v4784_v45, %v1814_v44 }
 0x708   : > { %v1826_v47 = vsub.f32 2.0, %v1822_v46 }
 0x70a   : > { %v1830_v49 = vmul.f32 %v4784_v45, %v1826_v47 }
 0x70c   : > { %v1834_v50 = vmul.f32 %v4776_v5, %v1830_v49 }
 0x70e   : > { %4548 = vmatmul.mubr.msk.f32.vlgmr.msra.gmra.mxu0 %vm1118_vm4, %v1834_v50 }
 0x70f   : > { %4556 = vmatpush3.xpose.msk.msra.mxu0 %vm812_vm3, %v2224_v43  ;;  %4557 = vmatprep.mubr.msk.f32.mxu0 %vm4886_vm2, %v4885_v36 }
 0x710   : > { %4565 = vmatprep.subr.mxu0 %v4885_v36 }
 0x712   : > { %4558 = vmatmul.mubr.msk.f32.vlgmr.msra.gmra.mxu0 %vm812_vm3, %v2222_v48 }
 0x713   : > { %4566 = vmatpush3.xpose.msk.msra.mxu0 %vm812_vm3, %v2380_v51  ;;  %4567 = vmatprep.mubr.msk.f32.mxu0 %vm4886_vm2, %v4885_v36 }
 0x714   : > { %4575 = vmatprep.subr.mxu0 %v4885_v36 }
 0x716   : > { %4568 = vmatmul.mubr.msk.f32.vlgmr.msra.gmra.mxu0 %vm812_vm3, %v2378_v52 }
 0x717   : > { %4577 = vmatprep.mubr.msk.f32.mxu0 %vm4886_vm2, %v4885_v36 }
 0x764   : > { %v5298_v53 = vpop.f32.mrf.mxu1 }
 0x766   : > { %v4534_v54 = vpop.f32.mrf.mxu1 }
 0x768   : > { %v5300_v55 = vpop.f32.mrf.mxu1 }
 0x76a   : > { %v4544_v56 = vpop.f32.mrf.mxu1 }
 0x76c   : > { %v2217_v57 = vpop.f32.mrf.mxu1 }
 0x76d   : > { %v2455_v58 = vsel %vm1118_vm4, %v2217_v57, -inf }
 0x76e   : > { %2456 = vmax.xlane.f32.xlu0 %v2455_v58  ;;  %v4554_v59 = vpop.f32.mrf.mxu1 }
 0x770   : > { %v2373_v60 = vpop.f32.mrf.mxu1 }
 0x771   : > { %v2461_v61 = vsel %vm1118_vm4, %v2373_v60, -inf }
 0x772   : > { %2462 = vmax.xlane.f32.xlu0 %v2461_v61  ;;  %v4564_v62 = vpop.f32.mrf.mxu1 }
 0x799   : > { %v5304_v0 = vpop.f32.mrf.mxu0 }
 0x79b   : > { %v4539_v1 = vpop.f32.mrf.mxu0 }
 0x7ce   : > { %v5306_v2 = vpop.f32.mrf.mxu0 }
 0x7d0   : > { %v4549_v3 = vpop.f32.mrf.mxu0 }
 0x7d2   : > { %v2295_v4 = vpop.f32.mrf.mxu0 }
 0x7d3   : > { %v2458_v5 = vsel %vm1118_vm4, %v2295_v4, -inf }
 0x7d4   : > { %2459 = vmax.xlane.f32.xlu1 %v2458_v5  ;;  %v4559_v6 = vpop.f32.mrf.mxu0 }
 0x7d6   : > { %v2451_v13 = vpop.f32.mrf.mxu0 }
 0x7d7   : > { %v2464_v14 = vsel %vm1118_vm4, %v2451_v13, -inf }
 0x7d8   : > { %v4569_v15 = vpop.f32.mrf.mxu0  ;;  %2465 = vmax.xlane.f32.xlu0 %v2464_v14 }
 0x7e5   : > { %2587 = vrot.lane.b32.xlu1 %v5122_v10, %s4891_s28 }
 0x7e9   : > { %2663 = vrot.lane.b32.xlu1 %v5184_v63, %s4891_s28 }
 0x7ed   : > { %2739 = vrot.lane.b32.xlu1 %v5158_v17, %s4891_s28 }
 0x7ee   : > { %2511 = vrot.lane.b32.xlu0 %v5117_v8, %s4891_s28 }
 0x7f7   : > { %v2457_v16 = vpop.xlane.xlu0 %2456 }
 0x7f8   : > { %v2467_v18 = vsub.f32 %v2217_v57, %v2457_v16 }
 0x7fa   : > { %v2471_v19 = vmul.f32 1.442695, %v2467_v18 }
 0x7fb   : > { %v2463_v20 = vpop.xlane.xlu0 %2462 }
 0x7fc   : > { %4785 = vpow2.f32 %v2471_v19  ;;  %v2469_v21 = vsub.f32 %v2373_v60, %v2463_v20 }
 0x7fe   : > { %v2475_v22 = vmul.f32 1.442695, %v2469_v21 }
 0x800   : > { %4787 = vpow2.f32 %v2475_v22 }
 0x809   : > { %v4786_v23 = vpop.eup %4785 }
 0x80a   : > { %v2479_v24 = vsel %vm1118_vm4, %v4786_v23, 0.0 }
 0x80d   : > { %v4788_v25 = vpop.eup %4787  ;;  %2480 = vadd.xlane.f32.xlu0 %v2479_v24 }
 0x80e   : > { %v2485_v26 = vsel %vm1118_vm4, %v4788_v25, 0.0 }
 0x811   : > { %2486 = vadd.xlane.f32.xlu0 %v2485_v26 }
 0x827   : > { %2817 = vrot.lane.b32.xlu0 %v5114_v7, %s4892_s16 }
 0x82b   : > { %2815 = vrot.lane.b32.xlu0 %v5114_v7, %s4893_s22 }
 0x82f   : > { %2973 = vrot.lane.b32.xlu0 %v5125_v11, %s4892_s16 }
 0x833   : > { %2971 = vrot.lane.b32.xlu0 %v5125_v11, %s4893_s22 }
 0x85d   : > { %v2460_v28 = vpop.xlane.xlu1 %2459 }
 0x85e   : > { %v2468_v30 = vsub.f32 %v2295_v4, %v2460_v28 }
 0x860   : > { %v2473_v32 = vmul.f32 1.442695, %v2468_v30 }
 0x861   : > { %v2588_v33 = vpop.permute.xlu1 %2587  ;;  %v2466_v34 = vpop.xlane.xlu0 %2465 }
 0x862   : > { %4789 = vpow2.f32 %v2473_v32  ;;  %4576 = vmatpush3.msra.mxu0 %v2588_v33  ;;  %v2470_v11 = vsub.f32 %v2451_v13, %v2466_v34 }
 0x863   : > { %4585 = vmatprep.subr.mxu0 %v4885_v36 }
 0x864   : > { %v2477_v38 = vmul.f32 1.442695, %v2470_v11 }
 0x865   : > { %v2512_v35 = vpop.permute.xlu0 %2511  ;;  %v2664_v56 = vpop.permute.xlu1 %2663 }
 0x866   : > { %4571 = vmatpush3.msra.mxu1 %v2512_v35  ;;  %4791 = vpow2.f32 %v2477_v38 }
 0x867   : > { %4580 = vmatprep.subr.mxu1 %v4885_v36 }
 0x869   : > { %v2740_v61 = vpop.permute.xlu1 %2739 }
 0x86f   : > { %v4790_v7 = vpop.eup %4789 }
 0x870   : > { %v2482_v37 = vsel %vm1118_vm4, %v4790_v7, 0.0 }
 0x871   : > { %2483 = vadd.xlane.f32.xlu1 %v2482_v37 }
 0x873   : > { %v4792_v42 = vpop.eup %4791 }
 0x874   : > { %v2488_v45 = vsel %vm1118_vm4, %v4792_v42, 0.0 }
 0x882   : > { %2895 = vrot.lane.b32.xlu1 %v5119_v9, %s4892_s16 }
 0x896   : > { %v2481_v39 = vpop.xlane.xlu0 %2480 }
 0x897   : > { %4793 = vrcp.f32 %v2481_v39 }
 0x89a   : > { %v2487_v41 = vpop.xlane.xlu0 %2486 }
 0x89b   : > { %4795 = vrcp.f32 %v2487_v41 }
 0x89e   : > { %v2818_v46 = vpop.permute.xlu0 %2817 }
 0x8a2   : > { %v2816_v54 = vpop.permute.xlu0 %2815 }
 0x8a4   : > { %v4794_v43 = vpop.eup %4793 }
 0x8a5   : > { %v2495_v44 = vmul.f32 %v4794_v43, %v2481_v39 }
 0x8a6   : > { %2489 = vadd.xlane.f32.xlu1 %v2488_v45  ;;  %v2974_v59 = vpop.permute.xlu0 %2973 }
 0x8a7   : > { %v2499_v47 = vsub.f32 2.0, %v2495_v44 }
 0x8a8   : > { %v4796_v48 = vpop.eup %4795 }
 0x8a9   : > { %v2503_v49 = vmul.f32 %v4794_v43, %v2499_v47  ;;  %v2497_v50 = vmul.f32 %v4796_v48, %v2487_v41 }
 0x8aa   : > { %v2972_v60 = vpop.permute.xlu0 %2971 }
 0x8ab   : > { %v2507_v51 = vmul.f32 %v4786_v23, %v2503_v49  ;;  %v2501_v52 = vsub.f32 2.0, %v2497_v50 }
 0x8ad   : > { %v2505_v57 = vmul.f32 %v4796_v48, %v2501_v52  ;;  %4573 = vmatmul.mubr.msk.f32.vlgmr.msra.gmra.mxu1 %vm1118_vm4, %v2507_v51 }
 0x8ae   : > { %4581 = vmatpush3.msra.mxu1 %v2664_v56  ;;  %4582 = vmatprep.mubr.msk.f32.mxu1 %vm4886_vm2, %v4885_v36 }
 0x8af   : > { %v2509_v58 = vmul.f32 %v4788_v25, %v2505_v57  ;;  %4590 = vmatprep.subr.mxu1 %v4885_v36 }
 0x8b1   : > { %4583 = vmatmul.mubr.msk.f32.vlgmr.msra.gmra.mxu1 %vm1118_vm4, %v2509_v58 }
 0x8b2   : > { %4591 = vmatpush3.xpose.msk.msra.mxu1 %vm812_vm3, %v2818_v46  ;;  %4592 = vmatprep.mubr.msk.f32.mxu1 %vm4886_vm2, %v4885_v36 }
 0x8b3   : > { %4600 = vmatprep.subr.mxu1 %v4885_v36 }
 0x8b5   : > { %4593 = vmatmul.mubr.msk.f32.vlgmr.msra.gmra.mxu1 %vm812_vm3, %v2816_v54 }
 0x8b6   : > { %4601 = vmatpush3.xpose.msk.msra.mxu1 %vm812_vm3, %v2974_v59  ;;  %4602 = vmatprep.mubr.msk.f32.mxu1 %vm4886_vm2, %v4885_v36 }
 0x8b7   : > { %2893 = vrot.lane.b32.xlu1 %v5119_v9, %s4893_s22  ;;  %4610 = vmatprep.subr.mxu1 %v4885_v36 }
 0x8b9   : > { %4603 = vmatmul.mubr.msk.f32.vlgmr.msra.gmra.mxu1 %vm812_vm3, %v2972_v60 }
 0x8ba   : > { %4612 = vmatprep.mubr.msk.f32.mxu1 %vm4886_vm2, %v4885_v36 }
 0x8bb   : > { %3051 = vrot.lane.b32.xlu1 %v5129_v12, %s4892_s16 }
 0x8bf   : > { %3049 = vrot.lane.b32.xlu1 %v5129_v12, %s4893_s22 }
 0x8fa   : > { %v2484_v62 = vpop.xlane.xlu1 %2483 }
 0x8fb   : > { %4797 = vrcp.f32 %v2484_v62 }
 0x8fe   : > { %v2896_v6 = vpop.permute.xlu1 %2895 }
 0x908   : > { %v4798_v1 = vpop.eup %4797 }
 0x909   : > { %v2496_v3 = vmul.f32 %v4798_v1, %v2484_v62 }
 0x90b   : > { %v2500_v9 = vsub.f32 2.0, %v2496_v3 }
 0x90d   : > { %v2504_v4 = vmul.f32 %v4798_v1, %v2500_v9 }
 0x90f   : > { %v2508_v5 = vmul.f32 %v4790_v7, %v2504_v4 }
 0x911   : > { %4578 = vmatmul.mubr.msk.f32.vlgmr.msra.gmra.mxu0 %vm1118_vm4, %v2508_v5 }
 0x912   : > { %4586 = vmatpush3.msra.mxu0 %v2740_v61  ;;  %4587 = vmatprep.mubr.msk.f32.mxu0 %vm4886_vm2, %v4885_v36 }
 0x913   : > { %4595 = vmatprep.subr.mxu0 %v4885_v36 }
 0x92f   : > { %v2490_v13 = vpop.xlane.xlu1 %2489 }
 0x930   : > { %4799 = vrcp.f32 %v2490_v13 }
 0x933   : > { %v2894_v16 = vpop.permute.xlu1 %2893 }
 0x937   : > { %v3052_v20 = vpop.permute.xlu1 %3051 }
 0x93b   : > { %v3050_v21 = vpop.permute.xlu1 %3049 }
 0x93d   : > { %v4800_v12 = vpop.eup %4799 }
 0x93e   : > { %v2498_v14 = vmul.f32 %v4800_v12, %v2490_v13 }
 0x940   : > { %v2502_v15 = vsub.f32 2.0, %v2498_v14 }
 0x942   : > { %v2506_v18 = vmul.f32 %v4800_v12, %v2502_v15 }
 0x944   : > { %v2510_v19 = vmul.f32 %v4792_v42, %v2506_v18 }
 0x946   : > { %4588 = vmatmul.mubr.msk.f32.vlgmr.msra.gmra.mxu0 %vm1118_vm4, %v2510_v19 }
 0x947   : > { %4596 = vmatpush3.xpose.msk.msra.mxu0 %vm812_vm3, %v2896_v6  ;;  %4597 = vmatprep.mubr.msk.f32.mxu0 %vm4886_vm2, %v4885_v36 }
 0x948   : > { %4605 = vmatprep.subr.mxu0 %v4885_v36 }
 0x94a   : > { %4598 = vmatmul.mubr.msk.f32.vlgmr.msra.gmra.mxu0 %vm812_vm3, %v2894_v16 }
 0x94b   : > { %4606 = vmatpush3.xpose.msk.msra.mxu0 %vm812_vm3, %v3052_v20  ;;  %4607 = vmatprep.mubr.msk.f32.mxu0 %vm4886_vm2, %v4885_v36 }
 0x94c   : > { %4615 = vmatprep.subr.mxu0 %v4885_v36 }
 0x94e   : > { %4608 = vmatmul.mubr.msk.f32.vlgmr.msra.gmra.mxu0 %vm812_vm3, %v3050_v21 }
 0x94f   : > { %4617 = vmatprep.mubr.msk.f32.mxu0 %vm4886_vm2, %v4885_v36 }
 0x96d   : > { %v2583_v22 = vpop.f32.mrf.mxu1 }
 0x96f   : > { %v4574_v23 = vpop.f32.mrf.mxu1 }
 0x971   : > { %v2735_v24 = vpop.f32.mrf.mxu1 }
 0x973   : > { %v4584_v25 = vpop.f32.mrf.mxu1 }
 0x975   : > { %v2889_v26 = vpop.f32.mrf.mxu1 }
 0x976   : > { %v3127_v28 = vsel %vm1118_vm4, %v2889_v26, -inf }
 0x977   : > { %3128 = vmax.xlane.f32.xlu0 %v3127_v28  ;;  %v4594_v30 = vpop.f32.mrf.mxu1 }
 0x979   : > { %v3045_v32 = vpop.f32.mrf.mxu1 }
 0x97a   : > { %v3133_v33 = vsel %vm1118_vm4, %v3045_v32, -inf }
 0x97b   : > { %3134 = vmax.xlane.f32.xlu0 %v3133_v33  ;;  %v4604_v34 = vpop.f32.mrf.mxu1 }
 0x9d1   : > { %v2659_v35 = vpop.f32.mrf.mxu0 }
 0x9d3   : > { %v4579_v7 = vpop.f32.mrf.mxu0 }
 0x9d4   : > { %v3555_v7 = vld [vmem:[%s5015_s30 + $0x38] sm:$0xff] }
 0xa00   : > { %v3129_v37 = vpop.xlane.xlu0 %3128 }
 0xa01   : > { %v3139_v11 = vsub.f32 %v2889_v26, %v3129_v37 }
 0xa03   : > { %v3143_v38 = vmul.f32 1.442695, %v3139_v11 }
 0xa04   : > { %v3135_v39 = vpop.xlane.xlu0 %3134 }
 0xa05   : > { %4801 = vpow2.f32 %v3143_v38  ;;  %v3141_v41 = vsub.f32 %v3045_v32, %v3135_v39 }
 0xa06   : > { %v2811_v42 = vpop.f32.mrf.mxu0 }
 0xa07   : > { %v3147_v43 = vmul.f32 1.442695, %v3141_v41 }
 0xa08   : > { %v4589_v44 = vpop.f32.mrf.mxu0 }
 0xa09   : > { %4803 = vpow2.f32 %v3147_v43  ;;  %v3554_v44 = vld [vmem:[%s5015_s30 + $0x30] sm:$0xff] }
 0xa0a   : > { %v2967_v45 = vpop.f32.mrf.mxu0 }
 0xa0b   : > { %v3130_v46 = vsel %vm1118_vm4, %v2967_v45, -inf }
 0xa0c   : > { %3131 = vmax.xlane.f32.xlu1 %v3130_v46  ;;  %v4599_v47 = vpop.f32.mrf.mxu0  ;;  %v3552_v46 = vld [vmem:[%s5015_s30 + $0x20] sm:$0xff] }
 0xa0d   : > { %v3551_v47 = vld [vmem:[%s5015_s30 + $0x18] sm:$0xff] }
 0xa0e   : > { %v3123_v48 = vpop.f32.mrf.mxu0 }
 0xa0f   : > { %v3136_v49 = vsel %vm1118_vm4, %v3123_v48, -inf }
 0xa10   : > { %v4609_v50 = vpop.f32.mrf.mxu0  ;;  %3137 = vmax.xlane.f32.xlu0 %v3136_v49 }
 0xa11   : > { %v3548_v50 = vld [vmem:[%s5015_s30] sm:$0xff] }
 0xa12   : > { %v4802_v51 = vpop.eup %4801 }
 0xa13   : > { %v3151_v52 = vsel %vm1118_vm4, %v4802_v51, 0.0 }
 0xa14   : > { %3152 = vadd.xlane.f32.xlu0 %v3151_v52 }
 0xa16   : > { %v4804_v54 = vpop.eup %4803 }
 0xa17   : > { %v3157_v56 = vsel %vm1118_vm4, %v4804_v54, 0.0 }
 0xa18   : > { %3158 = vadd.xlane.f32.xlu0 %v3157_v56 }
 0xa2e   : > { %3183 = vrot.lane.b32.xlu0 %v5117_v8, %s4893_s22 }
 0xa32   : > { %3491 = vrot.lane.b32.xlu0 %v5298_v53, %s4892_s16 }
 0xa36   : > { %3507 = vrot.lane.b32.xlu0 %v2583_v22, %s4890_s13 }
 0xa3a   : > { %3495 = vrot.lane.b32.xlu0 %v5300_v55, %s4892_s16 }
 0xa3e   : > { %3511 = vrot.lane.b32.xlu0 %v2735_v24, %s4890_s13 }
 0xa95   : > { %v3132_v57 = vpop.xlane.xlu1 %3131 }
 0xa96   : > { %v3140_v58 = vsub.f32 %v2967_v45, %v3132_v57  ;;  %v3553_v45 = vld [vmem:[%s5015_s30 + $0x28] sm:$0xff] }
 0xa98   : > { %v3145_v59 = vmul.f32 1.442695, %v3140_v58 }
 0xa99   : > { %v3138_v60 = vpop.xlane.xlu0 %3137 }
 0xa9a   : > { %4805 = vpow2.f32 %v3145_v59  ;;  %v3142_v6 = vsub.f32 %v3123_v48, %v3138_v60  ;;  %v3549_v48 = vld [vmem:[%s5015_s30 + $0x8] sm:$0xff] }
 0xa9c   : > { %v3149_v13 = vmul.f32 1.442695, %v3142_v6 }
 0xa9d   : > { %v3153_v61 = vpop.xlane.xlu0 %3152 }
 0xa9e   : > { %4807 = vrcp.f32 %v3153_v61 }
 0xa9f   : > { %4809 = vpow2.f32 %v3149_v13 }
 0xaa1   : > { %v3159_v62 = vpop.xlane.xlu0 %3158 }
 0xaa2   : > { %4811 = vrcp.f32 %v3159_v62 }
 0xaa5   : > { %v3184_v1 = vpop.permute.xlu0 %3183 }
 0xaa6   : > { %4611 = vmatpush3.msra.mxu1 %v3184_v1 }
 0xaa7   : > { %v4806_v8 = vpop.eup %4805  ;;  %4620 = vmatprep.subr.mxu1 %v4885_v36 }
 0xaa8   : > { %v3154_v53 = vsel %vm1118_vm4, %v4806_v8, 0.0 }
 0xaa9   : > { %3155 = vadd.xlane.f32.xlu1 %v3154_v53 }
 0xaab   : > { %v4808_v3 = vpop.eup %4807 }
 0xaac   : > { %v3167_v55 = vmul.f32 %v4808_v3, %v3153_v61  ;;  %v4810_v12 = vpop.eup %4809 }
 0xaad   : > { %v3160_v14 = vsel %vm1118_vm4, %v4810_v12, 0.0 }
 0xaae   : > { %v3171_v9 = vsub.f32 2.0, %v3167_v55 }
 0xab0   : > { %v3175_v4 = vmul.f32 %v4808_v3, %v3171_v9 }
 0xab2   : > { %v3179_v5 = vmul.f32 %v4802_v51, %v3175_v4 }
 0xab4   : > { %4613 = vmatmul.mubr.msk.f32.vlgmr.msra.gmra.mxu1 %vm1118_vm4, %v3179_v5 }
 0xab5   : > { %4622 = vmatprep.mubr.msk.f32.mxu1 %vm4886_vm2, %v4885_v36 }
 0xaba   : > { %3259 = vrot.lane.b32.xlu1 %v5122_v10, %s4893_s22  ;;  %v4812_v10 = vpop.eup %4811 }
 0xabe   : > { %3335 = vrot.lane.b32.xlu1 %v5184_v63, %s4893_s22  ;;  %v3169_v63 = vmul.f32 %v4812_v10, %v3159_v62 }
 0xac0   : > { %v3173_v15 = vsub.f32 2.0, %v3169_v63 }
 0xac2   : > { %v3177_v18 = vmul.f32 %v4812_v10, %v3173_v15 }
 0xae2   : > { %3161 = vadd.xlane.f32.xlu1 %v3160_v14  ;;  %v4841_v14 = vld [vmem:[#allocation2 + $0x8] sm:$0xff] }
 0xaf3   : > { %3411 = vrot.lane.b32.xlu1 %v5158_v17, %s4893_s22  ;;  %v3181_v17 = vmul.f32 %v4804_v54, %v3177_v18 }
 0xaf7   : > { %3493 = vrot.lane.b32.xlu1 %v5304_v0, %s4892_s16 }
 0xafb   : > { %3509 = vrot.lane.b32.xlu1 %v2659_v35, %s4890_s13 }
 0xaff   : > { %3497 = vrot.lane.b32.xlu1 %v5306_v2, %s4892_s16 }
 0xb03   : > { %3513 = vrot.lane.b32.xlu1 %v2811_v42, %s4890_s13 }
 0xb32   : > { %v3156_v16 = vpop.xlane.xlu1 %3155 }
 0xb33   : > { %4813 = vrcp.f32 %v3156_v16 }
 0xb36   : > { %v3260_v19 = vpop.permute.xlu1 %3259 }
 0xb37   : > { %4616 = vmatpush3.msra.mxu0 %v3260_v19 }
 0xb38   : > { %4625 = vmatprep.subr.mxu0 %v4885_v36 }
 0xb3a   : > { %v3336_v0 = vpop.permute.xlu1 %3335 }
 0xb3b   : > { %4621 = vmatpush3.msra.mxu1 %v3336_v0 }
 0xb3c   : > { %4623 = vmatmul.mubr.msk.f32.vlgmr.msra.gmra.mxu1 %vm1118_vm4, %v3181_v17  ;;  %4630 = vmatprep.subr.mxu1 %v3555_v7 }
 0xb3d   : > { %4631 = vmatpush3.msra.mxu1 %v3555_v7 }
 0xb3e   : > { %4632 = vmatprep.subr.mxu1 %v3554_v44 }
 0xb3f   : > { %4633 = vmatpush3.msra.mxu1 %v3554_v44 }
 0xb40   : > { %v4814_v20 = vpop.eup %4813  ;;  %4634 = vmatprep.subr.mxu1 %v3553_v45 }
 0xb41   : > { %v3168_v2 = vmul.f32 %v4814_v20, %v3156_v16  ;;  %4635 = vmatpush3.msra.mxu1 %v3553_v45  ;;  %v4842_v16 = vld [vmem:[#allocation2] sm:$0xff] }
 0xb42   : > { %4636 = vmatprep.subr.mxu1 %v3552_v46 }
 0xb43   : > { %v3172_v21 = vsub.f32 2.0, %v3168_v2  ;;  %4637 = vmatpush3.msra.mxu1 %v3552_v46  ;;  %v4843_v2 = vld [vmem:[#allocation2 + $0x18] sm:$0xff] }
 0xb44   : > { %4638 = vmatprep.subr.mxu1 %v3551_v47 }
 0xb45   : > { %v3176_v22 = vmul.f32 %v4814_v20, %v3172_v21  ;;  %4639 = vmatpush3.msra.mxu1 %v3551_v47 }
 0xb47   : > { %v3180_v23 = vmul.f32 %v4806_v8, %v3176_v22  ;;  %v4844_v22 = vld [vmem:[#allocation2 + $0x10] sm:$0xff] }
 0xb49   : > { %4618 = vmatmul.mubr.msk.f32.vlgmr.msra.gmra.mxu0 %vm1118_vm4, %v3180_v23 }
 0xb4a   : > { %4627 = vmatprep.mubr.msk.f32.mxu0 %vm4886_vm2, %v4885_v36  ;;  %v3492_v36 = vpop.permute.xlu0 %3491 }
 0xb4b   : > { %v3535_v39 = vsel %vm812_vm3, %v5222_v27, %v3492_v36  ;;  %v3550_v27 = vld [vmem:[%s5015_s30 + $0x10] sm:$0xff] }
 0xb4c   : > { %4640 = vmatprep.subr.mxu1 %v3550_v27 }
 0xb4d   : > { %4641 = vmatpush3.msra.mxu1 %v3550_v27 }
 0xb4e   : > { %v3508_v37 = vpop.permute.xlu0 %3507  ;;  %4642 = vmatprep.subr.mxu1 %v3549_v48 }
 0xb4f   : > { %v3539_v41 = vsel %vm626_vm1, %v3535_v39, %v3508_v37  ;;  %4643 = vmatpush3.msra.mxu1 %v3549_v48  ;;  %v3746_v39 = vld [vmem:[%s5037_s4 + $0x18] sm:$0xff] }
 0xb50   : > { %4644 = vmatprep.subr.mxu1 %v3548_v50 }
 0xb51   : > { %4645 = vmatpush3.msra.mxu1 %v3548_v50 }
 0xb52   : > { %v3496_v11 = vpop.permute.xlu0 %3495 }
 0xb53   : > { %v3537_v8 = vsel %vm812_vm3, %v5226_v31, %v3496_v11 }
 0xb56   : > { %v3512_v38 = vpop.permute.xlu0 %3511 }
 0xb57   : > { %v3541_v55 = vsel %vm626_vm1, %v3537_v8, %v3512_v38 }
 0xb6b   : > { %v3162_v24 = vpop.xlane.xlu1 %3161 }
 0xb6c   : > { %4815 = vrcp.f32 %v3162_v24 }
 0xb6f   : > { %v3412_v25 = vpop.permute.xlu1 %3411 }
 0xb70   : > { %4626 = vmatpush3.msra.mxu0 %v3412_v25 }
 0xb71   : > { %4652 = vmatprep.subr.mxu0 %v3746_v39 }
 0xb73   : > { %v3494_v58 = vpop.permute.xlu1 %3493 }
 0xb74   : > { %v3255_v26 = vpop.f32.mrf.mxu1  ;;  %v3536_v62 = vsel %vm812_vm3, %v5224_v29, %v3494_v58 }
 0xb75   : > { %3523 = vrot.lane.b32.xlu0 %v3255_v26, %s4888_s25 }
 0xb76   : > { %v4614_v28 = vpop.f32.mrf.mxu1 }
 0xb77   : > { %v3510_v59 = vpop.permute.xlu1 %3509 }
 0xb78   : > { %v3540_v53 = vsel %vm626_vm1, %v3536_v62, %v3510_v59 }
 0xb79   : > { %v4816_v30 = vpop.eup %4815 }
 0xb7a   : > { %v3170_v32 = vmul.f32 %v4816_v30, %v3162_v24 }
 0xb7b   : > { %v3498_v60 = vpop.permute.xlu1 %3497 }
 0xb7c   : > { %v3174_v33 = vsub.f32 2.0, %v3170_v32  ;;  %v3538_v29 = vsel %vm812_vm3, %v5230_v40, %v3498_v60 }
 0xb7e   : > { %v3178_v34 = vmul.f32 %v4816_v30, %v3174_v33 }
 0xb7f   : > { %v3514_v61 = vpop.permute.xlu1 %3513 }
 0xb80   : > { %v3182_v35 = vmul.f32 %v4810_v12, %v3178_v34  ;;  %v3542_v5 = vsel %vm626_vm1, %v3538_v29, %v3514_v61  ;;  %v4354_v12 = vld [vmem:[%s5590_s0] ss:$0 sm:$0xff] }
 0xb82   : > { %4628 = vmatmul.mubr.msk.f32.vlgmr.msra.gmra.mxu0 %vm1118_vm4, %v3182_v35 }
 0xb83   : > { %4653 = vmatpush3.msra.mxu0 %v3746_v39 }
 0xbe7   : > { %v3524_v42 = vpop.permute.xlu0 %3523 }
 0xbe8   : > { %v3544_v43 = vsel %vm3543_vm5, %v3539_v41, %v3524_v42  ;;  %v3745_v41 = vld [vmem:[%s5037_s4 + $0x10] sm:$0xff]  ;;  %v3744_v42 = vld [vmem:[%s5037_s4 + $0x8] sm:$0xff] }
 0xbe9   : > { %4646 = vmatprep.mubr.msk.f32.mxu1 %vm3556_vm6, %v3544_v43  ;;  %4654 = vmatprep.subr.mxu0 %v3745_v41  ;;  %v3743_v43 = vld [vmem:[%s5037_s4] sm:$0xff] }
 0xbea   : > { %4655 = vmatpush3.msra.mxu0 %v3745_v41 }
 0xbeb   : > { %4656 = vmatprep.subr.mxu0 %v3744_v42 }
 0xbec   : > { %4657 = vmatpush3.msra.mxu0 %v3744_v42 }
 0xbed   : > { %4658 = vmatprep.subr.mxu0 %v3743_v43 }
 0xbee   : > { %4659 = vmatpush3.msra.mxu0 %v3743_v43 }
 0xbfc   : > { %v3407_v49 = vpop.f32.mrf.mxu1 }
 0xbfd   : > { %3527 = vrot.lane.b32.xlu0 %v3407_v49, %s4888_s25 }
 0xbfe   : > { %v4624_v51 = vpop.f32.mrf.mxu1 }
 0xc09   : > { %v3331_v52 = vpop.f32.mrf.mxu0 }
 0xc0a   : > { %3525 = vrot.lane.b32.xlu1 %v3331_v52, %s4888_s25 }
 0xc0b   : > { %v4619_v54 = vpop.f32.mrf.mxu0 }
 0xc42   : > { %v3483_v56 = vpop.f32.mrf.mxu0 }
 0xc43   : > { %3529 = vrot.lane.b32.xlu1 %v3483_v56, %s4888_s25 }
 0xc44   : > { %v4629_v57 = vpop.f32.mrf.mxu0 }
 0xc6f   : > { %v3528_v1 = vpop.permute.xlu0 %3527 }
 0xc70   : > { %v3546_v4 = vsel %vm3543_vm5, %v3541_v55, %v3528_v1  ;;  %v4355_v1 = vld [vmem:[%s5591_s27] ss:$0 sm:$0xff] }
 0xc71   : > { %v4356_v55 = vld [vmem:[%s5592_s24] ss:$0 sm:$0xff] }
 0xc7c   : > { %v3526_v3 = vpop.permute.xlu1 %3525 }
 0xc7d   : > { %v3545_v9 = vsel %vm3543_vm5, %v3540_v53, %v3526_v3 }
 0xc7e   : > { %4647 = vmatmul.mubr.msk.f32.vlgmr.msra.gmra.mxu1 %vm3556_vm6, %v3545_v9 }
 0xc7f   : > { %4649 = vmatprep.mubr.msk.f32.mxu1 %vm3556_vm6, %v3546_v4 }
 0xcb5   : > { %v3530_v6 = vpop.permute.xlu1 %3529 }
 0xcb6   : > { %v3547_v31 = vsel %vm3543_vm5, %v3542_v5, %v3530_v6 }
 0xcb7   : > { %4650 = vmatmul.mubr.msk.f32.gmra.mxu1 %vm3556_vm6, %v3547_v31 }
 0xd3e   : > { %v4648_v13 = vpop.f32.mrf.mxu1 }
 0xd3f   : > { %v3655_v10 = vadd.f32 %v4841_v14, %v4648_v13 }
 0xd40   : > { %v3635_v63 = vpop.f32.mrf.mxu1 }
 0xd41   : > { %v5449_v15 = vadd.f32 %v4354_v12, %v3655_v10  ;;  %v3654_v40 = vadd.f32 %v4842_v16, %v3635_v63 }
 0xd43   : > { %v5451_v18 = vadd.f32 %v4354_v12, %v3654_v40  ;;  %v3674_v19 = vsel %vm626_vm1, %v5449_v15, 0.0 }
 0xd44   : > { %3675 = vadd.xlane.f32.xlu1 %v3674_v19 }
 0xd45   : > { %v3671_v17 = vsel %vm626_vm1, %v5451_v18, 0.0 }
 0xd46   : > { %3672 = vadd.xlane.f32.xlu0 %v3671_v17 }
 0xd77   : > { %v4651_v0 = vpop.f32.mrf.mxu1 }
 0xd78   : > { %v3657_v21 = vadd.f32 %v4843_v2, %v4651_v0  ;;  %v3974_v2 = vld [vmem:[%s5042_s15 + $0x38] sm:$0xff] }
 0xd79   : > { %v3645_v20 = vpop.f32.mrf.mxu1  ;;  %4666 = vmatprep.subr.mxu0 %v3974_v2 }
 0xd7a   : > { %v3656_v23 = vadd.f32 %v4844_v22, %v3645_v20  ;;  %v5459_v25 = vadd.f32 %v4354_v12, %v3657_v21  ;;  %v3973_v21 = vld [vmem:[%s5042_s15 + $0x30] sm:$0xff]  ;;  %v3972_v22 = vld [vmem:[%s5042_s15 + $0x28] sm:$0xff] }
 0xd7c   : > { %v5457_v24 = vadd.f32 %v4354_v12, %v3656_v23  ;;  %v3680_v28 = vsel %vm626_vm1, %v5459_v25, 0.0  ;;  %v3971_v23 = vld [vmem:[%s5042_s15 + $0x20] sm:$0xff] }
 0xd7e   : > { %v3677_v26 = vsel %vm626_vm1, %v5457_v24, 0.0 }
 0xd7f   : > { %3678 = vadd.xlane.f32.xlu0 %v3677_v26  ;;  %v3970_v26 = vld [vmem:[%s5042_s15 + $0x18] sm:$0xff] }
 0xd83   : > { %3681 = vadd.xlane.f32.xlu0 %v3680_v28  ;;  %v3969_v28 = vld [vmem:[%s5042_s15 + $0x10] sm:$0xff] }
 0xdcd   : > { %v3676_v30 = vpop.xlane.xlu1 %3675 }
 0xdce   : > { %v3684_v32 = vmul.f32 0.03125, %v3676_v30  ;;  %v3968_v30 = vld [vmem:[%s5042_s15 + $0x8] sm:$0xff] }
 0xdcf   : > { %v3673_v33 = vpop.xlane.xlu0 %3672 }
 0xdd0   : > { %v3688_v34 = vsub.f32 %v5449_v15, %v3684_v32  ;;  %v3683_v35 = vmul.f32 0.03125, %v3673_v33  ;;  %v3967_v32 = vld [vmem:[%s5042_s15] sm:$0xff] }
 0xdd1   : > { %v5504_v33 = vld [vmem:[%s592_s2] ss:$0 sm:$0xff] }
 0xdd2   : > { %v3687_v7 = vsub.f32 %v5451_v18, %v3683_v35  ;;  %v3692_v36 = vmul.f32 %v3688_v34, %v3688_v34 }
 0xdd4   : > { %v3698_v37 = vsel %vm626_vm1, %v3692_v36, 0.0  ;;  %v3691_v11 = vmul.f32 %v3687_v7, %v3687_v7 }
 0xdd5   : > { %3699 = vadd.xlane.f32.xlu1 %v3698_v37 }
 0xdd6   : > { %v3695_v38 = vsel %vm626_vm1, %v3691_v11, 0.0 }
 0xdd7   : > { %3696 = vadd.xlane.f32.xlu0 %v3695_v38 }
 0xe08   : > { %v3679_v44 = vpop.xlane.xlu0 %3678 }
 0xe09   : > { %v3685_v45 = vmul.f32 0.03125, %v3679_v44 }
 0xe0b   : > { %v3689_v46 = vsub.f32 %v5457_v24, %v3685_v45 }
 0xe0c   : > { %v3682_v47 = vpop.xlane.xlu0 %3681 }
 0xe0d   : > { %v3686_v27 = vmul.f32 0.03125, %v3682_v47  ;;  %v3693_v48 = vmul.f32 %v3689_v46, %v3689_v46 }
 0xe0f   : > { %v3690_v49 = vsub.f32 %v5459_v25, %v3686_v27  ;;  %v3701_v50 = vsel %vm626_vm1, %v3693_v48, 0.0 }
 0xe10   : > { %3702 = vadd.xlane.f32.xlu0 %v3701_v50 }
 0xe11   : > { %v3694_v51 = vmul.f32 %v3690_v49, %v3690_v49 }
 0xe13   : > { %v3704_v52 = vsel %vm626_vm1, %v3694_v51, 0.0 }
 0xe14   : > { %3705 = vadd.xlane.f32.xlu1 %v3704_v52 }
 0xe5e   : > { %v3700_v54 = vpop.xlane.xlu1 %3699 }
 0xe5f   : > { %v3708_v56 = vmul.f32 0.03125, %v3700_v54 }
 0xe60   : > { %v3697_v57 = vpop.xlane.xlu0 %3696 }
 0xe61   : > { %v3712_v58 = vadd.f32 1e-05, %v3708_v56  ;;  %v3707_v59 = vmul.f32 0.03125, %v3697_v57 }
 0xe63   : > { %4817 = vrsqrt.f32 %v3712_v58  ;;  %v3711_v60 = vadd.f32 1e-05, %v3707_v59 }
 0xe65   : > { %4819 = vrsqrt.f32 %v3711_v60 }
 0xe70   : > { %v4818_v61 = vpop.eup %4817 }
 0xe71   : > { %v3720_v62 = vmul.f32 %v4818_v61, %v3688_v34 }
 0xe72   : > { %v4820_v8 = vpop.eup %4819 }
 0xe73   : > { %v3719_v53 = vmul.f32 %v4820_v8, %v3687_v7  ;;  %v3730_v3 = vmul.f32 %v4355_v1, %v3720_v62 }
 0xe75   : > { %v3729_v9 = vmul.f32 %v4355_v1, %v3719_v53  ;;  %v3740_v29 = vadd.f32 %v4356_v55, %v3730_v3 }
 0xe77   : > { %v3739_v4 = vadd.f32 %v4356_v55, %v3729_v9 }
 0xe79   : > { %4660 = vmatprep.mubr.msk.f32.mxu0 %vm626_vm1, %v3739_v4 }
 0xe7a   : > { %4661 = vmatmul.mubr.msk.f32.vlgmr.msra.gmra.mxu0 %vm626_vm1, %v3740_v29 }
 0xe7b   : > { %4667 = vmatpush3.msra.mxu0 %v3974_v2 }
 0xe7c   : > { %4668 = vmatprep.subr.mxu0 %v3973_v21 }
 0xe7d   : > { %4669 = vmatpush3.msra.mxu0 %v3973_v21 }
 0xe7e   : > { %4670 = vmatprep.subr.mxu0 %v3972_v22 }
 0xe7f   : > { %4671 = vmatpush3.msra.mxu0 %v3972_v22 }
 0xe80   : > { %4672 = vmatprep.subr.mxu0 %v3971_v23 }
 0xe81   : > { %4673 = vmatpush3.msra.mxu0 %v3971_v23 }
 0xe82   : > { %4674 = vmatprep.subr.mxu0 %v3970_v26 }
 0xe83   : > { %4675 = vmatpush3.msra.mxu0 %v3970_v26 }
 0xe84   : > { %4676 = vmatprep.subr.mxu0 %v3969_v28 }
 0xe85   : > { %4677 = vmatpush3.msra.mxu0 %v3969_v28 }
 0xe86   : > { %4678 = vmatprep.subr.mxu0 %v3968_v30 }
 0xe87   : > { %4679 = vmatpush3.msra.mxu0 %v3968_v30 }
 0xe88   : > { %4680 = vmatprep.subr.mxu0 %v3967_v32 }
 0xe89   : > { %4681 = vmatpush3.msra.mxu0 %v3967_v32 }
 0xe99   : > { %v3703_v5 = vpop.xlane.xlu0 %3702 }
 0xe9a   : > { %v3709_v6 = vmul.f32 0.03125, %v3703_v5 }
 0xe9c   : > { %v3713_v31 = vadd.f32 1e-05, %v3709_v6 }
 0xe9d   : > { %v3706_v13 = vpop.xlane.xlu1 %3705 }
 0xe9e   : > { %4821 = vrsqrt.f32 %v3713_v31  ;;  %v3710_v12 = vmul.f32 0.03125, %v3706_v13 }
 0xea0   : > { %v3714_v14 = vadd.f32 1e-05, %v3710_v12 }
 0xea2   : > { %4823 = vrsqrt.f32 %v3714_v14 }
 0xeab   : > { %v4822_v10 = vpop.eup %4821 }
 0xeac   : > { %v3721_v63 = vmul.f32 %v4822_v10, %v3689_v46 }
 0xeae   : > { %v3731_v16 = vmul.f32 %v4355_v1, %v3721_v63 }
 0xeaf   : > { %v4824_v40 = vpop.eup %4823 }
 0xeb0   : > { %v3741_v19 = vadd.f32 %v4356_v55, %v3731_v16  ;;  %v3722_v17 = vmul.f32 %v4824_v40, %v3690_v49 }
 0xeb2   : > { %4663 = vmatprep.mubr.msk.f32.mxu0 %vm626_vm1, %v3741_v19  ;;  %v3732_v0 = vmul.f32 %v4355_v1, %v3722_v17 }
 0xeb4   : > { %v3742_v20 = vadd.f32 %v4356_v55, %v3732_v0 }
 0xeb6   : > { %4664 = vmatmul.mubr.msk.f32.gmra.mxu0 %vm626_vm1, %v3742_v20 }
 0xf3a   : > { %v4662_v34 = vpop.f32.mrf.mxu0 }
 0xf3b   : > { %v3838_v35 = vadd.f32 %v4662_v34, %v5504_v33 }
 0xf3c   : > { %v3832_v7 = vpop.f32.mrf.mxu0 }
 0xf3d   : > { %v3856_v36 = vmul.f32 0.70710677, %v3838_v35  ;;  %v3833_v37 = vadd.f32 %v5504_v33, %v3832_v7  ;;  %v3852_v30 = vmul.f32 0.5, %v3838_v35 }
 0xf3f   : > { %v3860_v11 = vand.u32 2147483647, %v3856_v36  ;;  %v3855_v38 = vmul.f32 0.70710677, %v3833_v37  ;;  %vm3948_vm7 = vcmp.ge.f32.partialorder %v3856_v36, 0.0  ;;  %v3851_v26 = vmul.f32 0.5, %v3833_v37 }
 0xf41   : > { %v3864_v39 = vmul.f32 0.3275911, %v3860_v11  ;;  %v3859_v41 = vand.u32 2147483647, %v3855_v38  ;;  %v3924_v45 = vsub.f32 0.0, %v3860_v11  ;;  %vm3947_vm8 = vcmp.ge.f32.partialorder %v3855_v38, 0.0 }
 0xf43   : > { %v3868_v42 = vadd.f32 1.0, %v3864_v39  ;;  %v3863_v43 = vmul.f32 0.3275911, %v3859_v41  ;;  %v3923_v27 = vsub.f32 0.0, %v3859_v41  ;;  %v3928_v50 = vmul.f32 %v3924_v45, %v3860_v11 }
 0xf45   : > { %4825 = vrcp.f32 %v3868_v42  ;;  %v3867_v44 = vadd.f32 1.0, %v3863_v43  ;;  %v3927_v56 = vmul.f32 %v3923_v27, %v3859_v41  ;;  %v3933_v58 = vmul.f32 1.442695, %v3928_v50 }
 0xf47   : > { %4827 = vrcp.f32 %v3867_v44  ;;  %v3931_v62 = vmul.f32 1.442695, %v3927_v56 }
 0xf48   : > { %4829 = vpow2.f32 %v3933_v58 }
 0xf49   : > { %4831 = vpow2.f32 %v3931_v62 }
 0xf52   : > { %v4826_v46 = vpop.eup %4825 }
 0xf53   : > { %v3876_v47 = vmul.f32 %v4826_v46, %v3868_v42 }
 0xf54   : > { %v4828_v48 = vpop.eup %4827 }
 0xf55   : > { %v3880_v49 = vsub.f32 2.0, %v3876_v47  ;;  %v3875_v51 = vmul.f32 %v4828_v48, %v3867_v44  ;;  %v4830_v14 = vpop.eup %4829 }
 0xf56   : > { %v4832_v40 = vpop.eup %4831 }
 0xf57   : > { %v3884_v52 = vmul.f32 %v4826_v46, %v3880_v49  ;;  %v3879_v54 = vsub.f32 2.0, %v3875_v51 }
 0xf59   : > { %v3888_v57 = vmul.f32 1.0614054, %v3884_v52  ;;  %v3883_v59 = vmul.f32 %v4828_v48, %v3879_v54 }
 0xf5b   : > { %v3892_v60 = vadd.f32 -1.4531521, %v3888_v57  ;;  %v3887_v61 = vmul.f32 1.0614054, %v3883_v59 }
 0xf5d   : > { %v3896_v1 = vmul.f32 %v3892_v60, %v3884_v52  ;;  %v3891_v8 = vadd.f32 -1.4531521, %v3887_v61 }
 0xf5f   : > { %v3900_v53 = vadd.f32 1.4214138, %v3896_v1  ;;  %v3895_v3 = vmul.f32 %v3891_v8, %v3883_v59 }
 0xf61   : > { %v3904_v55 = vmul.f32 %v3900_v53, %v3884_v52  ;;  %v3899_v9 = vadd.f32 1.4214138, %v3895_v3 }
 0xf63   : > { %v3908_v4 = vadd.f32 -0.28449672, %v3904_v55  ;;  %v3903_v29 = vmul.f32 %v3899_v9, %v3883_v59 }
 0xf65   : > { %v3912_v5 = vmul.f32 %v3908_v4, %v3884_v52  ;;  %v3907_v6 = vadd.f32 -0.28449672, %v3903_v29 }
 0xf67   : > { %v3916_v31 = vadd.f32 0.2548296, %v3912_v5  ;;  %v3911_v13 = vmul.f32 %v3907_v6, %v3883_v59 }
 0xf69   : > { %v3920_v12 = vmul.f32 %v3916_v31, %v3884_v52  ;;  %v3915_v10 = vadd.f32 0.2548296, %v3911_v13 }
 0xf6b   : > { %v3940_v63 = vmul.f32 %v4830_v14, %v3920_v12  ;;  %v3919_v16 = vmul.f32 %v3915_v10, %v3883_v59 }
 0xf6d   : > { %v3944_v19 = vsub.f32 1.0, %v3940_v63  ;;  %v3939_v17 = vmul.f32 %v4832_v40, %v3919_v16 }
 0xf6f   : > { %v3952_v0 = vsub.f32 0.0, %v3944_v19  ;;  %v3943_v20 = vsub.f32 1.0, %v3939_v17 }
 0xf71   : > { %v3956_v2 = vsel %vm3948_vm7, %v3944_v19, %v3952_v0  ;;  %v3951_v21 = vsub.f32 0.0, %v3943_v20 }
 0xf72   : > { %v3960_v22 = vadd.f32 1.0, %v3956_v2 }
 0xf73   : > { %v3955_v23 = vsel %vm3947_vm8, %v3943_v20, %v3951_v21 }
 0xf74   : > { %v3959_v28 = vadd.f32 1.0, %v3955_v23  ;;  %v3964_v11 = vmul.f32 %v3960_v22, %v3852_v30 }
 0xf76   : > { %v4665_v32 = vpop.f32.mrf.mxu0  ;;  %v3963_v34 = vmul.f32 %v3959_v28, %v3851_v26 }
 0xf77   : > { %v5509_v7 = vadd.f32 %v4665_v32, %v5504_v33 }
 0xf78   : > { %v3842_v39 = vpop.f32.mrf.mxu0  ;;  %4682 = vmatprep.mubr.msk.f32.mxu0 %vm3556_vm6, %v3963_v34 }
 0xf79   : > { %v3858_v41 = vmul.f32 0.70710677, %v5509_v7  ;;  %v3843_v36 = vadd.f32 %v5504_v33, %v3842_v39  ;;  %4683 = vmatmul.mubr.msk.f32.vlgmr.msra.gmra.mxu0 %vm3556_vm6, %v3964_v11  ;;  %v3854_v30 = vmul.f32 0.5, %v5509_v7  ;;  %v4366_v39 = vld [vmem:[%s600_s20] ss:$0 sm:$0xff] }
 0xf7b   : > { %v3862_v38 = vand.u32 2147483647, %v3858_v41  ;;  %v3857_v42 = vmul.f32 0.70710677, %v3843_v36  ;;  %vm3950_vm9 = vcmp.ge.f32.partialorder %v3858_v41, 0.0  ;;  %v3853_v26 = vmul.f32 0.5, %v3843_v36 }
 0xf7d   : > { %v3866_v37 = vmul.f32 0.3275911, %v3862_v38  ;;  %v3861_v43 = vand.u32 2147483647, %v3857_v42  ;;  %v3926_v46 = vsub.f32 0.0, %v3862_v38  ;;  %vm3949_vm10 = vcmp.ge.f32.partialorder %v3857_v42, 0.0 }
 0xf7f   : > { %v3870_v35 = vadd.f32 1.0, %v3866_v37  ;;  %v3865_v44 = vmul.f32 0.3275911, %v3861_v43  ;;  %v3925_v48 = vsub.f32 0.0, %v3861_v43  ;;  %v3930_v33 = vmul.f32 %v3926_v46, %v3862_v38 }
 0xf81   : > { %4833 = vrcp.f32 %v3870_v35  ;;  %v3869_v45 = vadd.f32 1.0, %v3865_v44  ;;  %v3929_v56 = vmul.f32 %v3925_v48, %v3861_v43  ;;  %v3937_v58 = vmul.f32 1.442695, %v3930_v33 }
 0xf83   : > { %4835 = vrcp.f32 %v3869_v45  ;;  %v3935_v62 = vmul.f32 1.442695, %v3929_v56 }
 0xf84   : > { %4837 = vpow2.f32 %v3937_v58 }
 0xf85   : > { %4839 = vpow2.f32 %v3935_v62 }
 0xf8e   : > { %v4834_v47 = vpop.eup %4833 }
 0xf8f   : > { %v3878_v27 = vmul.f32 %v4834_v47, %v3870_v35 }
 0xf90   : > { %v4836_v49 = vpop.eup %4835 }
 0xf91   : > { %v3882_v50 = vsub.f32 2.0, %v3878_v27  ;;  %v3877_v51 = vmul.f32 %v4836_v49, %v3869_v45  ;;  %v4838_v14 = vpop.eup %4837 }
 0xf92   : > { %v4840_v40 = vpop.eup %4839 }
 0xf93   : > { %v3886_v52 = vmul.f32 %v4834_v47, %v3882_v50  ;;  %v3881_v54 = vsub.f32 2.0, %v3877_v51 }
 0xf95   : > { %v3890_v57 = vmul.f32 1.0614054, %v3886_v52  ;;  %v3885_v59 = vmul.f32 %v4836_v49, %v3881_v54 }
 0xf97   : > { %v3894_v60 = vadd.f32 -1.4531521, %v3890_v57  ;;  %v3889_v61 = vmul.f32 1.0614054, %v3885_v59 }
 0xf99   : > { %v3898_v1 = vmul.f32 %v3894_v60, %v3886_v52  ;;  %v3893_v8 = vadd.f32 -1.4531521, %v3889_v61 }
 0xf9b   : > { %v3902_v53 = vadd.f32 1.4214138, %v3898_v1  ;;  %v3897_v3 = vmul.f32 %v3893_v8, %v3885_v59 }
 0xf9d   : > { %v3906_v55 = vmul.f32 %v3902_v53, %v3886_v52  ;;  %v3901_v9 = vadd.f32 1.4214138, %v3897_v3 }
 0xf9f   : > { %v3910_v4 = vadd.f32 -0.28449672, %v3906_v55  ;;  %v3905_v29 = vmul.f32 %v3901_v9, %v3885_v59 }
 0xfa1   : > { %v3914_v5 = vmul.f32 %v3910_v4, %v3886_v52  ;;  %v3909_v6 = vadd.f32 -0.28449672, %v3905_v29 }
 0xfa3   : > { %v3918_v31 = vadd.f32 0.2548296, %v3914_v5  ;;  %v3913_v13 = vmul.f32 %v3909_v6, %v3885_v59 }
 0xfa5   : > { %v3922_v12 = vmul.f32 %v3918_v31, %v3886_v52  ;;  %v3917_v10 = vadd.f32 0.2548296, %v3913_v13 }
 0xfa7   : > { %v3942_v63 = vmul.f32 %v4838_v14, %v3922_v12  ;;  %v3921_v16 = vmul.f32 %v3917_v10, %v3885_v59 }
 0xfa9   : > { %v3946_v19 = vsub.f32 1.0, %v3942_v63  ;;  %v3941_v17 = vmul.f32 %v4840_v40, %v3921_v16 }
 0xfab   : > { %v3954_v0 = vsub.f32 0.0, %v3946_v19  ;;  %v3945_v20 = vsub.f32 1.0, %v3941_v17 }
 0xfad   : > { %v3958_v2 = vsel %vm3950_vm9, %v3946_v19, %v3954_v0  ;;  %v3953_v21 = vsub.f32 0.0, %v3945_v20 }
 0xfae   : > { %v3962_v22 = vadd.f32 1.0, %v3958_v2 }
 0xfaf   : > { %v3957_v23 = vsel %vm3949_vm10, %v3945_v20, %v3953_v21 }
 0xfb0   : > { %v3961_v28 = vadd.f32 1.0, %v3957_v23  ;;  %v3966_v34 = vmul.f32 %v3962_v22, %v3854_v30 }
 0xfb2   : > { %v3965_v32 = vmul.f32 %v3961_v28, %v3853_v26 }
 0xfb4   : > { %4685 = vmatprep.mubr.msk.f32.mxu0 %vm3556_vm6, %v3965_v32 }
 0xfb5   : > { %4686 = vmatmul.mubr.msk.f32.gmra.mxu0 %vm3556_vm6, %v3966_v34 }
0x1039   : > { %v4684_v11 = vpop.f32.mrf.mxu0 }
0x103a   : > { %v4073_v41 = vadd.f32 %v4684_v11, %v5449_v15 }
0x103b   : > { %v4053_v38 = vpop.f32.mrf.mxu0 }
0x103c   : > { %v4084_v42 = vadd.f32 %v4366_v39, %v4073_v41  ;;  %v4072_v36 = vadd.f32 %v4053_v38, %v5451_v18 }
0x103e   : > { %4088 = vst.msk [vmem:[#allocation2 + $0x8] sm:$0xff] %vm626_vm1, %v4084_v42  ;;  %v4083_v7 = vadd.f32 %v4366_v39, %v4072_v36 }
0x1040   : > { %4087 = vst.msk [vmem:[#allocation2] sm:$0xff] %vm626_vm1, %v4083_v7 }
0x1075   : > { %v4687_v37 = vpop.f32.mrf.mxu0 }
0x1076   : > { %v4075_v43 = vadd.f32 %v4687_v37, %v5459_v25 }
0x1077   : > { %v4063_v35 = vpop.f32.mrf.mxu0 }
0x1078   : > { %v4086_v44 = vadd.f32 %v4366_v39, %v4075_v43  ;;  %v4074_v45 = vadd.f32 %v4063_v35, %v5457_v24  ;;  %4094 = sbr.rel (%p4367_p8) target bundleno = 4223 (0x107f), region = 76 }
0x107a   : > { %4090 = vst.msk [vmem:[#allocation2 + $0x18] sm:$0xff] %vm626_vm1, %v4086_v44  ;;  %v4085_v46 = vadd.f32 %v4366_v39, %v4074_v45 }
0x107c   : > { %4089 = vst.msk [vmem:[#allocation2 + $0x10] sm:$0xff] %vm626_vm1, %v4085_v46 }
0x107d   : > { %4095 = vst.msk [vmem:[%s5051_s17] sm:$0xff] %vm626_vm1, %v4083_v7  ;;  %4096 = vst.msk [vmem:[%s5051_s17 + $0x8] sm:$0xff] %vm626_vm1, %v4084_v42 }
0x107e   : > { %4097 = vst.msk [vmem:[%s5051_s17 + $0x10] sm:$0xff] %vm626_vm1, %v4085_v46  ;;  %4098 = vst.msk [vmem:[%s5051_s17 + $0x18] sm:$0xff] %vm626_vm1, %v4086_v44 }
0x107f PF: > { %s5594_s20 = sld [smem:[#allocation6_spill]] }
0x1080   : > { %s5595_s21 = sld [smem:[#allocation4_spill]] }
0x1081   : > { %s5596_s22 = sld [smem:[#allocation5_spill]] }
0x1082   : > { %s5597_s23 = sld [smem:[#allocation7_spill]] }
0x1083   : > { %s5598_s24 = sld [smem:[#allocation8_spill]] }
0x1085   : > { %s22_s25 = sadd.s32 1, %s5594_s20  }
0x1086   : > { %p19_p9 = scmp.ge.s32.totalorder %s22_s25, 6  }
0x1088   :  { %21 = sbr.rel (!%p19_p9) target bundleno = 5 (0x5), region = 139 }

</bundles_post_ra>
